<compile_context>
chip_gen: v7x
topology: tpu7x:2x2x1
jax: 0.10.0
libtpu: 0.0.40
codegen_flags: <defaults>
</compile_context>

<pallas_src>
import math
import functools

import jax
import jax.numpy as jnp
from jax.experimental import pallas as pl
from jax.experimental.pallas import tpu as pltpu

_INNER_DIM = 2048


# ---------------------------------------------------------------------------
# Kernel 1: fused QKV attention + output projection + residual + LayerNorm1
# ---------------------------------------------------------------------------
def _attn_ln_kernel(x_ref, mask_ref, wqkv_ref, bqkv_ref, wo_ref, bo_ref,
                    gamma_ref, beta_ref, o_ref, *, head, dk, emb, eps):
    x = x_ref[0]                      # (S, E)
    mask = mask_ref[0]                # (1, S)

    # Additive mask, computed ONCE (hoisted out of the per-head loop).
    neg = jnp.where(mask == 0.0, -1e10, 0.0)                       # (1, S)

    # Fused QKV projection: one wide (S, E) @ (E, 3E) MXU pass.
    qkv = jnp.dot(x, wqkv_ref[...], preferred_element_type=jnp.float32) + bqkv_ref[...]
    scale = 1.0 / math.sqrt(dk)
    q = qkv[:, :emb] * scale          # fold 1/sqrt(dk) once into q
    k = qkv[:, emb:2 * emb]
    v = qkv[:, 2 * emb:]

    # Per-head attention, accumulating directly through Wo (no concatenate).
    acc = None
    for h in range(head):             # static unroll over heads
        sl = slice(h * dk, (h + 1) * dk)
        s = jnp.dot(q[:, sl], k[:, sl].T, preferred_element_type=jnp.float32) + neg
        s_max = jnp.max(s, axis=-1, keepdims=True)
        e = jnp.exp(s - s_max)
        inv = pl.reciprocal(jnp.sum(e, axis=-1, keepdims=True), approx=True)
        p = e * inv                                                 # softmax (S, S)
        ctx = jnp.dot(p, v[:, sl], preferred_element_type=jnp.float32)          # (S, dk)
        contrib = jnp.dot(ctx, wo_ref[sl, :], preferred_element_type=jnp.float32)
        acc = contrib if acc is None else acc + contrib
    attn = acc + bo_ref[...]

    # Fused residual + LayerNorm1 epilogue (torch x.std(): unbiased, eps on std).
    z = attn + x
    mean = jnp.mean(z, axis=-1, keepdims=True)
    var = jnp.sum((z - mean) ** 2, axis=-1, keepdims=True) / (emb - 1)
    std = jnp.sqrt(var)
    o_ref[0] = gamma_ref[...] * (z - mean) / (std + eps) + beta_ref[...]


def attention_layernorm(x, mask, p, head, eps=1e-6):
    B, S, E = x.shape
    dk = E // head

    # Fuse Wq/Wk/Wv into a single (E, 3E) weight (one-time, outside the kernel).
    wqkv = jnp.concatenate([p["wq"], p["wk"], p["wv"]], axis=1)     # (E, 3E)
    bqkv = jnp.concatenate([p["bq"], p["bk"], p["bv"]], axis=1)     # (1, 3E)

    kernel = functools.partial(_attn_ln_kernel, head=head, dk=dk, emb=E, eps=eps)

    def w_spec(shape):
        return pl.BlockSpec(shape, lambda b: (0,) * len(shape))

    flops = 2 * B * S * E * 3 * E + 4 * B * head * S * S * dk + 2 * B * S * E * E
    cost = pl.CostEstimate(
        flops=flops,
        transcendentals=B * head * S * S,
        bytes_accessed=4 * (2 * B * S * E + B * S + 4 * E * E + 6 * E),
    )

    return pl.pallas_call(
        kernel,
        out_shape=jax.ShapeDtypeStruct((B, S, E), jnp.float32),
        grid=(B,),
        in_specs=[
            pl.BlockSpec((1, S, E), lambda b: (b, 0, 0)),   # x
            pl.BlockSpec((1, 1, S), lambda b: (b, 0, 0)),   # mask
            w_spec((E, 3 * E)), w_spec((1, 3 * E)),         # Wqkv, bqkv (resident)
            w_spec((E, E)), w_spec((1, E)),                 # Wo, bo
            w_spec((1, E)), w_spec((1, E)),                 # gamma1, beta1
        ],
        out_specs=pl.BlockSpec((1, S, E), lambda b: (b, 0, 0)),
        compiler_params=pltpu.CompilerParams(dimension_semantics=("parallel",)),
        cost_estimate=cost,
    )(x, mask, wqkv, bqkv, p["wo"], p["bo"], p["gamma1"], p["beta1"])


# ---------------------------------------------------------------------------
# Kernel 2: fused FFN (Linear -> ReLU -> Linear) + residual + LayerNorm2
# ---------------------------------------------------------------------------
def _ffn_ln_kernel(x_ref, w1_ref, b1_ref, w2_ref, b2_ref, gamma_ref, beta_ref,
                   o_ref, *, emb, eps):
    x = x_ref[...]                                                    # (TILE_N, E)
    h = jnp.dot(x, w1_ref[...], preferred_element_type=jnp.float32) + b1_ref[...]
    h = jnp.maximum(h, 0.0)
    y = jnp.dot(h, w2_ref[...], preferred_element_type=jnp.float32) + b2_ref[...]
    z = y + x                                                         # residual
    mean = jnp.mean(z, axis=-1, keepdims=True)
    var = jnp.sum((z - mean) ** 2, axis=-1, keepdims=True) / (emb - 1)
    std = jnp.sqrt(var)
    o_ref[...] = gamma_ref[...] * (z - mean) / (std + eps) + beta_ref[...]


def ffn_layernorm(h1, p, eps=1e-6, tile_n=256):
    B, S, E = h1.shape
    N = B * S
    F = p["w1"].shape[1]
    x2d = h1.reshape(N, E)

    # Row tile: multiple of 8, capped so the (TILE_N, 2048) f32 hidden plus
    # weights stays far below v7x's ~32 MiB scoped VMEM budget.
    tn = N if N <= tile_n else tile_n
    grid = (pl.cdiv(N, tn),)

    kernel = functools.partial(_ffn_ln_kernel, emb=E, eps=eps)

    def w_spec(shape):
        return pl.BlockSpec(shape, lambda i: (0,) * len(shape))

    cost = pl.CostEstimate(
        flops=4 * N * E * F,
        transcendentals=0,
        bytes_accessed=4 * (2 * N * E + 2 * E * F + F + 3 * E),
    )

    out = pl.pallas_call(
        kernel,
        out_shape=jax.ShapeDtypeStruct((N, E), jnp.float32),
        grid=grid,
        in_specs=[
            pl.BlockSpec((tn, E), lambda i: (i, 0)),        # activation tile
            w_spec((E, F)), w_spec((1, F)),                 # W1, b1 (resident)
            w_spec((F, E)), w_spec((1, E)),                 # W2, b2
            w_spec((1, E)), w_spec((1, E)),                 # gamma2, beta2
        ],
        out_specs=pl.BlockSpec((tn, E), lambda i: (i, 0)),
        compiler_params=pltpu.CompilerParams(dimension_semantics=("parallel",)),
        cost_estimate=cost,
    )(x2d, p["w1"], p["b1"], p["w2"], p["b2"], p["gamma2"], p["beta2"])
    return out.reshape(B, S, E)


# ---------------------------------------------------------------------------
# EncoderLayer forward (two fused pallas_calls)
# ---------------------------------------------------------------------------
def encoder_layer(x, x_mask, params, head):
    # attention + dropout1(identity) + residual + LayerNorm1  (one kernel)
    h1 = attention_layernorm(x, x_mask, params, head)
    # FFN + dropout2(identity) + residual + LayerNorm2        (one kernel)
    return ffn_layernorm(h1, params)


# ---------------------------------------------------------------------------
# Deterministic parameter initialization (PyTorch-like uniform fan-in init)
# ---------------------------------------------------------------------------
def init_params(key, embedding_dim, inner_dim=_INNER_DIM):
    def linear(k, fan_in, fan_out):
        bound = 1.0 / math.sqrt(fan_in)
        kw, kb = jax.random.split(k)
        w = jax.random.uniform(kw, (fan_in, fan_out), jnp.float32, -bound, bound)
        b = jax.random.uniform(kb, (1, fan_out), jnp.float32, -bound, bound)
        return w, b

    ks = jax.random.split(key, 6)
    wq, bq = linear(ks[0], embedding_dim, embedding_dim)
    wk, bk = linear(ks[1], embedding_dim, embedding_dim)
    wv, bv = linear(ks[2], embedding_dim, embedding_dim)
    wo, bo = linear(ks[3], embedding_dim, embedding_dim)
    w1, b1 = linear(ks[4], embedding_dim, inner_dim)
    w2, b2 = linear(ks[5], inner_dim, embedding_dim)
    return {
        "wq": wq, "bq": bq, "wk": wk, "bk": bk, "wv": wv, "bv": bv,
        "wo": wo, "bo": bo,
        "gamma1": jnp.ones((1, embedding_dim), jnp.float32),
        "beta1": jnp.zeros((1, embedding_dim), jnp.float32),
        "w1": w1, "b1": b1, "w2": w2, "b2": b2,
        "gamma2": jnp.ones((1, embedding_dim), jnp.float32),
        "beta2": jnp.zeros((1, embedding_dim), jnp.float32),
    }


if __name__ == "__main__":
    HEAD, EMB, SEQ, BATCH = 4, 32, 8, 2

    key = jax.random.PRNGKey(0)
    kx, kp = jax.random.split(key)
    x = jax.random.normal(kx, (BATCH, SEQ, EMB), jnp.float32)

    # padding mask: batch 1 has its last two positions masked out
    x_mask = jnp.ones((BATCH, 1, SEQ), jnp.float32)
    x_mask = x_mask.at[1, 0, SEQ - 2:].set(0.0)

    params = init_params(kp, EMB)

    fwd = jax.jit(functools.partial(encoder_layer, head=HEAD))
    out = fwd(x, x_mask, params)
    jax.block_until_ready(out)

    assert out.shape == (BATCH, SEQ, EMB)
    assert out.dtype == jnp.float32
    assert bool(jnp.all(jnp.isfinite(out)))
    print("KERNEL_OK")
</pallas_src>

<mosaic_0001>
module attributes {stable_mosaic.version = 11 : i64} {
  func.func @_attn_ln_kernel(%arg0: i32, %arg1: memref<1x8x32xf32, #tpu.memory_space<vmem>>, %arg2: memref<1x1x8xf32, #tpu.memory_space<vmem>>, %arg3: memref<32x96xf32, #tpu.memory_space<vmem>>, %arg4: memref<1x96xf32, #tpu.memory_space<vmem>>, %arg5: memref<32x32xf32, #tpu.memory_space<vmem>>, %arg6: memref<1x32xf32, #tpu.memory_space<vmem>>, %arg7: memref<1x32xf32, #tpu.memory_space<vmem>>, %arg8: memref<1x32xf32, #tpu.memory_space<vmem>>, %arg9: memref<1x8x32xf32, #tpu.memory_space<vmem>>) attributes {dimension_semantics = [#tpu.dimension_semantics<parallel>], iteration_bounds = array<i64: 2>, scalar_prefetch = 0 : i64, scratch_operands = 0 : i64, tpu.core_type = #tpu.core_type<tc>, window_params = [{transform_indices = @transform_0, window_bounds = array<i64: 1, 8, 32>}, {transform_indices = @transform_1, window_bounds = array<i64: 1, 1, 8>}, {pipeline_mode = #tpu.pipeline_mode<synchronous>, transform_indices = @transform_2, window_bounds = array<i64: 32, 96>}, {pipeline_mode = #tpu.pipeline_mode<synchronous>, transform_indices = @transform_3, window_bounds = array<i64: 1, 96>}, {pipeline_mode = #tpu.pipeline_mode<synchronous>, transform_indices = @transform_4, window_bounds = array<i64: 32, 32>}, {pipeline_mode = #tpu.pipeline_mode<synchronous>, transform_indices = @transform_5, window_bounds = array<i64: 1, 32>}, {pipeline_mode = #tpu.pipeline_mode<synchronous>, transform_indices = @transform_6, window_bounds = array<i64: 1, 32>}, {pipeline_mode = #tpu.pipeline_mode<synchronous>, transform_indices = @transform_7, window_bounds = array<i64: 1, 32>}, {transform_indices = @transform_8, window_bounds = array<i64: 1, 8, 32>}]} {
    %c0 = arith.constant 0 : index
    %c0_0 = arith.constant 0 : index
    %c0_1 = arith.constant 0 : index
    %0 = vector.load %arg1[%c0, %c0_0, %c0_1] : memref<1x8x32xf32, #tpu.memory_space<vmem>>, vector<1x8x32xf32>
    %1 = vector.shape_cast %0 : vector<1x8x32xf32> to vector<8x32xf32>
    %c0_2 = arith.constant 0 : index
    %c0_3 = arith.constant 0 : index
    %c0_4 = arith.constant 0 : index
    %2 = vector.load %arg2[%c0_2, %c0_3, %c0_4] : memref<1x1x8xf32, #tpu.memory_space<vmem>>, vector<1x1x8xf32>
    %3 = vector.shape_cast %2 : vector<1x1x8xf32> to vector<1x8xf32>
    %cst = arith.constant 0.000000e+00 : f32
    %4 = vector.broadcast %cst : f32 to vector<1x8xf32>
    %5 = arith.cmpf oeq, %3, %4 : vector<1x8xf32>
    %cst_5 = arith.constant -1.000000e+10 : f32
    %cst_6 = arith.constant 0.000000e+00 : f32
    %6 = vector.broadcast %cst_5 : f32 to vector<1x8xf32>
    %7 = vector.broadcast %cst_6 : f32 to vector<1x8xf32>
    %8 = arith.select %5, %6, %7 : vector<1x8xi1>, vector<1x8xf32>
    %c0_7 = arith.constant 0 : index
    %c0_8 = arith.constant 0 : index
    %9 = vector.load %arg3[%c0_7, %c0_8] : memref<32x96xf32, #tpu.memory_space<vmem>>, vector<32x96xf32>
    %cst_9 = arith.constant dense<0.000000e+00> : vector<8x96xf32>
    %10 = tpu.matmul %1, %9, %cst_9 {dimension_numbers = #tpu.dot_dimension_numbers<[1], [0], [0], [1], [0, 0, 1, 1], [], []>} : vector<8x32xf32>, vector<32x96xf32>, vector<8x96xf32> -> vector<8x96xf32>
    %c0_10 = arith.constant 0 : index
    %c0_11 = arith.constant 0 : index
    %11 = vector.load %arg4[%c0_10, %c0_11] : memref<1x96xf32, #tpu.memory_space<vmem>>, vector<1x96xf32>
    %12 = vector.broadcast %11 : vector<1x96xf32> to vector<8x96xf32>
    %13 = arith.addf %10, %12 : vector<8x96xf32>
    %14 = vector.extract_strided_slice %13 {offsets = [0, 0], sizes = [8, 32], strides = [1, 1]} : vector<8x96xf32> to vector<8x32xf32>
    %cst_12 = arith.constant 0.353553385 : f32
    %15 = vector.broadcast %cst_12 : f32 to vector<8x32xf32>
    %16 = arith.mulf %14, %15 : vector<8x32xf32>
    %17 = vector.extract_strided_slice %13 {offsets = [0, 32], sizes = [8, 32], strides = [1, 1]} : vector<8x96xf32> to vector<8x32xf32>
    %18 = vector.extract_strided_slice %13 {offsets = [0, 64], sizes = [8, 32], strides = [1, 1]} : vector<8x96xf32> to vector<8x32xf32>
    %19 = vector.extract_strided_slice %16 {offsets = [0, 0], sizes = [8, 8], strides = [1, 1]} : vector<8x32xf32> to vector<8x8xf32>
    %20 = vector.extract_strided_slice %17 {offsets = [0, 0], sizes = [8, 8], strides = [1, 1]} : vector<8x32xf32> to vector<8x8xf32>
    %21 = tpu.transpose %20, [1, 0] : vector<8x8xf32> -> vector<8x8xf32>
    %cst_13 = arith.constant dense<0.000000e+00> : vector<8x8xf32>
    %22 = tpu.matmul %19, %21, %cst_13 {dimension_numbers = #tpu.dot_dimension_numbers<[1], [0], [0], [1], [0, 0, 1, 1], [], []>} : vector<8x8xf32>, vector<8x8xf32>, vector<8x8xf32> -> vector<8x8xf32>
    %23 = vector.broadcast %8 : vector<1x8xf32> to vector<8x8xf32>
    %24 = arith.addf %22, %23 : vector<8x8xf32>
    %cst_14 = arith.constant dense<0xFF800000> : vector<8xf32>
    %25 = vector.multi_reduction <maximumf>, %24, %cst_14 [1] : vector<8x8xf32> to vector<8xf32>
    %26 = vector.shape_cast %25 : vector<8xf32> to vector<8x1xf32>
    %27 = vector.broadcast %26 : vector<8x1xf32> to vector<8x8xf32>
    %28 = arith.subf %24, %27 : vector<8x8xf32>
    %29 = math.exp %28 : vector<8x8xf32>
    %cst_15 = arith.constant dense<0.000000e+00> : vector<8xf32>
    %30 = vector.multi_reduction <add>, %29, %cst_15 [1] : vector<8x8xf32> to vector<8xf32>
    %31 = vector.shape_cast %30 : vector<8xf32> to vector<8x1xf32>
    %32 = tpu.reciprocal %31 {approx = true} : vector<8x1xf32> -> vector<8x1xf32>
    %33 = vector.broadcast %32 : vector<8x1xf32> to vector<8x8xf32>
    %34 = arith.mulf %29, %33 : vector<8x8xf32>
    %35 = vector.extract_strided_slice %18 {offsets = [0, 0], sizes = [8, 8], strides = [1, 1]} : vector<8x32xf32> to vector<8x8xf32>
    %cst_16 = arith.constant dense<0.000000e+00> : vector<8x8xf32>
    %36 = tpu.matmul %34, %35, %cst_16 {dimension_numbers = #tpu.dot_dimension_numbers<[1], [0], [0], [1], [0, 0, 1, 1], [], []>} : vector<8x8xf32>, vector<8x8xf32>, vector<8x8xf32> -> vector<8x8xf32>
    %c0_17 = arith.constant 0 : index
    %c0_18 = arith.constant 0 : index
    %37 = vector.load %arg5[%c0_17, %c0_18] : memref<32x32xf32, #tpu.memory_space<vmem>>, vector<8x32xf32>
    %cst_19 = arith.constant dense<0.000000e+00> : vector<8x32xf32>
    %38 = tpu.matmul %36, %37, %cst_19 {dimension_numbers = #tpu.dot_dimension_numbers<[1], [0], [0], [1], [0, 0, 1, 1], [], []>} : vector<8x8xf32>, vector<8x32xf32>, vector<8x32xf32> -> vector<8x32xf32>
    %39 = vector.extract_strided_slice %16 {offsets = [0, 8], sizes = [8, 8], strides = [1, 1]} : vector<8x32xf32> to vector<8x8xf32>
    %40 = vector.extract_strided_slice %17 {offsets = [0, 8], sizes = [8, 8], strides = [1, 1]} : vector<8x32xf32> to vector<8x8xf32>
    %41 = tpu.transpose %40, [1, 0] : vector<8x8xf32> -> vector<8x8xf32>
    %cst_20 = arith.constant dense<0.000000e+00> : vector<8x8xf32>
    %42 = tpu.matmul %39, %41, %cst_20 {dimension_numbers = #tpu.dot_dimension_numbers<[1], [0], [0], [1], [0, 0, 1, 1], [], []>} : vector<8x8xf32>, vector<8x8xf32>, vector<8x8xf32> -> vector<8x8xf32>
    %43 = vector.broadcast %8 : vector<1x8xf32> to vector<8x8xf32>
    %44 = arith.addf %42, %43 : vector<8x8xf32>
    %cst_21 = arith.constant dense<0xFF800000> : vector<8xf32>
    %45 = vector.multi_reduction <maximumf>, %44, %cst_21 [1] : vector<8x8xf32> to vector<8xf32>
    %46 = vector.shape_cast %45 : vector<8xf32> to vector<8x1xf32>
    %47 = vector.broadcast %46 : vector<8x1xf32> to vector<8x8xf32>
    %48 = arith.subf %44, %47 : vector<8x8xf32>
    %49 = math.exp %48 : vector<8x8xf32>
    %cst_22 = arith.constant dense<0.000000e+00> : vector<8xf32>
    %50 = vector.multi_reduction <add>, %49, %cst_22 [1] : vector<8x8xf32> to vector<8xf32>
    %51 = vector.shape_cast %50 : vector<8xf32> to vector<8x1xf32>
    %52 = tpu.reciprocal %51 {approx = true} : vector<8x1xf32> -> vector<8x1xf32>
    %53 = vector.broadcast %52 : vector<8x1xf32> to vector<8x8xf32>
    %54 = arith.mulf %49, %53 : vector<8x8xf32>
    %55 = vector.extract_strided_slice %18 {offsets = [0, 8], sizes = [8, 8], strides = [1, 1]} : vector<8x32xf32> to vector<8x8xf32>
    %cst_23 = arith.constant dense<0.000000e+00> : vector<8x8xf32>
    %56 = tpu.matmul %54, %55, %cst_23 {dimension_numbers = #tpu.dot_dimension_numbers<[1], [0], [0], [1], [0, 0, 1, 1], [], []>} : vector<8x8xf32>, vector<8x8xf32>, vector<8x8xf32> -> vector<8x8xf32>
    %c8 = arith.constant 8 : index
    %c0_24 = arith.constant 0 : index
    %57 = vector.load %arg5[%c8, %c0_24] : memref<32x32xf32, #tpu.memory_space<vmem>>, vector<8x32xf32>
    %cst_25 = arith.constant dense<0.000000e+00> : vector<8x32xf32>
    %58 = tpu.matmul %56, %57, %cst_25 {dimension_numbers = #tpu.dot_dimension_numbers<[1], [0], [0], [1], [0, 0, 1, 1], [], []>} : vector<8x8xf32>, vector<8x32xf32>, vector<8x32xf32> -> vector<8x32xf32>
    %59 = arith.addf %38, %58 : vector<8x32xf32>
    %60 = vector.extract_strided_slice %16 {offsets = [0, 16], sizes = [8, 8], strides = [1, 1]} : vector<8x32xf32> to vector<8x8xf32>
    %61 = vector.extract_strided_slice %17 {offsets = [0, 16], sizes = [8, 8], strides = [1, 1]} : vector<8x32xf32> to vector<8x8xf32>
    %62 = tpu.transpose %61, [1, 0] : vector<8x8xf32> -> vector<8x8xf32>
    %cst_26 = arith.constant dense<0.000000e+00> : vector<8x8xf32>
    %63 = tpu.matmul %60, %62, %cst_26 {dimension_numbers = #tpu.dot_dimension_numbers<[1], [0], [0], [1], [0, 0, 1, 1], [], []>} : vector<8x8xf32>, vector<8x8xf32>, vector<8x8xf32> -> vector<8x8xf32>
    %64 = vector.broadcast %8 : vector<1x8xf32> to vector<8x8xf32>
    %65 = arith.addf %63, %64 : vector<8x8xf32>
    %cst_27 = arith.constant dense<0xFF800000> : vector<8xf32>
    %66 = vector.multi_reduction <maximumf>, %65, %cst_27 [1] : vector<8x8xf32> to vector<8xf32>
    %67 = vector.shape_cast %66 : vector<8xf32> to vector<8x1xf32>
    %68 = vector.broadcast %67 : vector<8x1xf32> to vector<8x8xf32>
    %69 = arith.subf %65, %68 : vector<8x8xf32>
    %70 = math.exp %69 : vector<8x8xf32>
    %cst_28 = arith.constant dense<0.000000e+00> : vector<8xf32>
    %71 = vector.multi_reduction <add>, %70, %cst_28 [1] : vector<8x8xf32> to vector<8xf32>
    %72 = vector.shape_cast %71 : vector<8xf32> to vector<8x1xf32>
    %73 = tpu.reciprocal %72 {approx = true} : vector<8x1xf32> -> vector<8x1xf32>
    %74 = vector.broadcast %73 : vector<8x1xf32> to vector<8x8xf32>
    %75 = arith.mulf %70, %74 : vector<8x8xf32>
    %76 = vector.extract_strided_slice %18 {offsets = [0, 16], sizes = [8, 8], strides = [1, 1]} : vector<8x32xf32> to vector<8x8xf32>
    %cst_29 = arith.constant dense<0.000000e+00> : vector<8x8xf32>
    %77 = tpu.matmul %75, %76, %cst_29 {dimension_numbers = #tpu.dot_dimension_numbers<[1], [0], [0], [1], [0, 0, 1, 1], [], []>} : vector<8x8xf32>, vector<8x8xf32>, vector<8x8xf32> -> vector<8x8xf32>
    %c16 = arith.constant 16 : index
    %c0_30 = arith.constant 0 : index
    %78 = vector.load %arg5[%c16, %c0_30] : memref<32x32xf32, #tpu.memory_space<vmem>>, vector<8x32xf32>
    %cst_31 = arith.constant dense<0.000000e+00> : vector<8x32xf32>
    %79 = tpu.matmul %77, %78, %cst_31 {dimension_numbers = #tpu.dot_dimension_numbers<[1], [0], [0], [1], [0, 0, 1, 1], [], []>} : vector<8x8xf32>, vector<8x32xf32>, vector<8x32xf32> -> vector<8x32xf32>
    %80 = arith.addf %59, %79 : vector<8x32xf32>
    %81 = vector.extract_strided_slice %16 {offsets = [0, 24], sizes = [8, 8], strides = [1, 1]} : vector<8x32xf32> to vector<8x8xf32>
    %82 = vector.extract_strided_slice %17 {offsets = [0, 24], sizes = [8, 8], strides = [1, 1]} : vector<8x32xf32> to vector<8x8xf32>
    %83 = tpu.transpose %82, [1, 0] : vector<8x8xf32> -> vector<8x8xf32>
    %cst_32 = arith.constant dense<0.000000e+00> : vector<8x8xf32>
    %84 = tpu.matmul %81, %83, %cst_32 {dimension_numbers = #tpu.dot_dimension_numbers<[1], [0], [0], [1], [0, 0, 1, 1], [], []>} : vector<8x8xf32>, vector<8x8xf32>, vector<8x8xf32> -> vector<8x8xf32>
    %85 = vector.broadcast %8 : vector<1x8xf32> to vector<8x8xf32>
    %86 = arith.addf %84, %85 : vector<8x8xf32>
    %cst_33 = arith.constant dense<0xFF800000> : vector<8xf32>
    %87 = vector.multi_reduction <maximumf>, %86, %cst_33 [1] : vector<8x8xf32> to vector<8xf32>
    %88 = vector.shape_cast %87 : vector<8xf32> to vector<8x1xf32>
    %89 = vector.broadcast %88 : vector<8x1xf32> to vector<8x8xf32>
    %90 = arith.subf %86, %89 : vector<8x8xf32>
    %91 = math.exp %90 : vector<8x8xf32>
    %cst_34 = arith.constant dense<0.000000e+00> : vector<8xf32>
    %92 = vector.multi_reduction <add>, %91, %cst_34 [1] : vector<8x8xf32> to vector<8xf32>
    %93 = vector.shape_cast %92 : vector<8xf32> to vector<8x1xf32>
    %94 = tpu.reciprocal %93 {approx = true} : vector<8x1xf32> -> vector<8x1xf32>
    %95 = vector.broadcast %94 : vector<8x1xf32> to vector<8x8xf32>
    %96 = arith.mulf %91, %95 : vector<8x8xf32>
    %97 = vector.extract_strided_slice %18 {offsets = [0, 24], sizes = [8, 8], strides = [1, 1]} : vector<8x32xf32> to vector<8x8xf32>
    %cst_35 = arith.constant dense<0.000000e+00> : vector<8x8xf32>
    %98 = tpu.matmul %96, %97, %cst_35 {dimension_numbers = #tpu.dot_dimension_numbers<[1], [0], [0], [1], [0, 0, 1, 1], [], []>} : vector<8x8xf32>, vector<8x8xf32>, vector<8x8xf32> -> vector<8x8xf32>
    %c24 = arith.constant 24 : index
    %c0_36 = arith.constant 0 : index
    %99 = vector.load %arg5[%c24, %c0_36] : memref<32x32xf32, #tpu.memory_space<vmem>>, vector<8x32xf32>
    %cst_37 = arith.constant dense<0.000000e+00> : vector<8x32xf32>
    %100 = tpu.matmul %98, %99, %cst_37 {dimension_numbers = #tpu.dot_dimension_numbers<[1], [0], [0], [1], [0, 0, 1, 1], [], []>} : vector<8x8xf32>, vector<8x32xf32>, vector<8x32xf32> -> vector<8x32xf32>
    %101 = arith.addf %80, %100 : vector<8x32xf32>
    %c0_38 = arith.constant 0 : index
    %c0_39 = arith.constant 0 : index
    %102 = vector.load %arg6[%c0_38, %c0_39] : memref<1x32xf32, #tpu.memory_space<vmem>>, vector<1x32xf32>
    %103 = vector.broadcast %102 : vector<1x32xf32> to vector<8x32xf32>
    %104 = arith.addf %101, %103 : vector<8x32xf32>
    %105 = arith.addf %104, %1 : vector<8x32xf32>
    %cst_40 = arith.constant dense<0.000000e+00> : vector<8xf32>
    %106 = vector.multi_reduction <add>, %105, %cst_40 [1] : vector<8x32xf32> to vector<8xf32>
    %107 = vector.shape_cast %106 : vector<8xf32> to vector<8x1xf32>
    %cst_41 = arith.constant 3.200000e+01 : f32
    %108 = vector.broadcast %cst_41 : f32 to vector<8x1xf32>
    %109 = arith.divf %107, %108 : vector<8x1xf32>
    %110 = vector.broadcast %109 : vector<8x1xf32> to vector<8x32xf32>
    %111 = arith.subf %105, %110 : vector<8x32xf32>
    %112 = arith.mulf %111, %111 : vector<8x32xf32>
    %cst_42 = arith.constant dense<0.000000e+00> : vector<8xf32>
    %113 = vector.multi_reduction <add>, %112, %cst_42 [1] : vector<8x32xf32> to vector<8xf32>
    %114 = vector.shape_cast %113 : vector<8xf32> to vector<8x1xf32>
    %cst_43 = arith.constant 3.100000e+01 : f32
    %115 = vector.broadcast %cst_43 : f32 to vector<8x1xf32>
    %116 = arith.divf %114, %115 : vector<8x1xf32>
    %117 = math.sqrt %116 : vector<8x1xf32>
    %c0_44 = arith.constant 0 : index
    %c0_45 = arith.constant 0 : index
    %118 = vector.load %arg7[%c0_44, %c0_45] : memref<1x32xf32, #tpu.memory_space<vmem>>, vector<1x32xf32>
    %119 = vector.broadcast %109 : vector<8x1xf32> to vector<8x32xf32>
    %120 = arith.subf %105, %119 : vector<8x32xf32>
    %121 = vector.broadcast %118 : vector<1x32xf32> to vector<8x32xf32>
    %122 = arith.mulf %121, %120 : vector<8x32xf32>
    %cst_46 = arith.constant 9.99999997E-7 : f32
    %123 = vector.broadcast %cst_46 : f32 to vector<8x1xf32>
    %124 = arith.addf %117, %123 : vector<8x1xf32>
    %125 = vector.broadcast %124 : vector<8x1xf32> to vector<8x32xf32>
    %126 = arith.divf %122, %125 : vector<8x32xf32>
    %c0_47 = arith.constant 0 : index
    %c0_48 = arith.constant 0 : index
    %127 = vector.load %arg8[%c0_47, %c0_48] : memref<1x32xf32, #tpu.memory_space<vmem>>, vector<1x32xf32>
    %128 = vector.broadcast %127 : vector<1x32xf32> to vector<8x32xf32>
    %129 = arith.addf %126, %128 : vector<8x32xf32>
    %c0_49 = arith.constant 0 : index
    %c0_50 = arith.constant 0 : index
    %c0_51 = arith.constant 0 : index
    %130 = vector.load %arg9[%c0_49, %c0_50, %c0_51] : memref<1x8x32xf32, #tpu.memory_space<vmem>>, vector<1x8x32xf32>
    %131 = vector.shape_cast %130 : vector<1x8x32xf32> to vector<8x32xf32>
    %132 = vector.shape_cast %129 : vector<8x32xf32> to vector<1x8x32xf32>
    tpu.vector_store %arg9[%c0_49, %c0_50, %c0_51], %132 {strides = array<i32>} : memref<1x8x32xf32, #tpu.memory_space<vmem>>, vector<1x8x32xf32>,
    return
  }
  func.func @transform_0(%arg0: i32) -> (i32, i32, i32) {
    %c0_i32 = arith.constant 0 : i32
    %c0_i32_0 = arith.constant 0 : i32
    %c0_i32_1 = arith.constant 0 : i32
    return %arg0, %c0_i32, %c0_i32_0 : i32, i32, i32
  }
  func.func @transform_1(%arg0: i32) -> (i32, i32, i32) {
    %c0_i32 = arith.constant 0 : i32
    %c0_i32_0 = arith.constant 0 : i32
    %c0_i32_1 = arith.constant 0 : i32
    return %arg0, %c0_i32, %c0_i32_0 : i32, i32, i32
  }
  func.func @transform_2(%arg0: i32) -> (i32, i32) {
    %c0_i32 = arith.constant 0 : i32
    %c0_i32_0 = arith.constant 0 : i32
    %c0_i32_1 = arith.constant 0 : i32
    return %c0_i32, %c0_i32_0 : i32, i32
  }
  func.func @transform_3(%arg0: i32) -> (i32, i32) {
    %c0_i32 = arith.constant 0 : i32
    %c0_i32_0 = arith.constant 0 : i32
    %c0_i32_1 = arith.constant 0 : i32
    return %c0_i32, %c0_i32_0 : i32, i32
  }
  func.func @transform_4(%arg0: i32) -> (i32, i32) {
    %c0_i32 = arith.constant 0 : i32
    %c0_i32_0 = arith.constant 0 : i32
    %c0_i32_1 = arith.constant 0 : i32
    return %c0_i32, %c0_i32_0 : i32, i32
  }
  func.func @transform_5(%arg0: i32) -> (i32, i32) {
    %c0_i32 = arith.constant 0 : i32
    %c0_i32_0 = arith.constant 0 : i32
    %c0_i32_1 = arith.constant 0 : i32
    return %c0_i32, %c0_i32_0 : i32, i32
  }
  func.func @transform_6(%arg0: i32) -> (i32, i32) {
    %c0_i32 = arith.constant 0 : i32
    %c0_i32_0 = arith.constant 0 : i32
    %c0_i32_1 = arith.constant 0 : i32
    return %c0_i32, %c0_i32_0 : i32, i32
  }
  func.func @transform_7(%arg0: i32) -> (i32, i32) {
    %c0_i32 = arith.constant 0 : i32
    %c0_i32_0 = arith.constant 0 : i32
    %c0_i32_1 = arith.constant 0 : i32
    return %c0_i32, %c0_i32_0 : i32, i32
  }
  func.func @transform_8(%arg0: i32) -> (i32, i32, i32) {
    %c0_i32 = arith.constant 0 : i32
    %c0_i32_0 = arith.constant 0 : i32
    %c0_i32_1 = arith.constant 0 : i32
    return %arg0, %c0_i32, %c0_i32_0 : i32, i32, i32
  }
}

module attributes {stable_mosaic.version = 11 : i64} {
  func.func @_ffn_ln_kernel(%arg0: i32, %arg1: memref<16x32xf32, #tpu.memory_space<vmem>>, %arg2: memref<32x2048xf32, #tpu.memory_space<vmem>>, %arg3: memref<1x2048xf32, #tpu.memory_space<vmem>>, %arg4: memref<2048x32xf32, #tpu.memory_space<vmem>>, %arg5: memref<1x32xf32, #tpu.memory_space<vmem>>, %arg6: memref<1x32xf32, #tpu.memory_space<vmem>>, %arg7: memref<1x32xf32, #tpu.memory_space<vmem>>, %arg8: memref<16x32xf32, #tpu.memory_space<vmem>>) attributes {dimension_semantics = [#tpu.dimension_semantics<parallel>], iteration_bounds = array<i64: 1>, scalar_prefetch = 0 : i64, scratch_operands = 0 : i64, tpu.core_type = #tpu.core_type<tc>, window_params = [{transform_indices = @transform_0, window_bounds = array<i64: 16, 32>}, {pipeline_mode = #tpu.pipeline_mode<synchronous>, transform_indices = @transform_1, window_bounds = array<i64: 32, 2048>}, {pipeline_mode = #tpu.pipeline_mode<synchronous>, transform_indices = @transform_2, window_bounds = array<i64: 1, 2048>}, {pipeline_mode = #tpu.pipeline_mode<synchronous>, transform_indices = @transform_3, window_bounds = array<i64: 2048, 32>}, {pipeline_mode = #tpu.pipeline_mode<synchronous>, transform_indices = @transform_4, window_bounds = array<i64: 1, 32>}, {pipeline_mode = #tpu.pipeline_mode<synchronous>, transform_indices = @transform_5, window_bounds = array<i64: 1, 32>}, {pipeline_mode = #tpu.pipeline_mode<synchronous>, transform_indices = @transform_6, window_bounds = array<i64: 1, 32>}, {transform_indices = @transform_7, window_bounds = array<i64: 16, 32>}]} {
    %c0 = arith.constant 0 : index
    %c0_0 = arith.constant 0 : index
    %0 = vector.load %arg1[%c0, %c0_0] : memref<16x32xf32, #tpu.memory_space<vmem>>, vector<16x32xf32>
    %c0_1 = arith.constant 0 : index
    %c0_2 = arith.constant 0 : index
    %1 = vector.load %arg2[%c0_1, %c0_2] : memref<32x2048xf32, #tpu.memory_space<vmem>>, vector<32x2048xf32>
    %cst = arith.constant dense<0.000000e+00> : vector<16x2048xf32>
    %2 = tpu.matmul %0, %1, %cst {dimension_numbers = #tpu.dot_dimension_numbers<[1], [0], [0], [1], [0, 0, 1, 1], [], []>} : vector<16x32xf32>, vector<32x2048xf32>, vector<16x2048xf32> -> vector<16x2048xf32>
    %c0_3 = arith.constant 0 : index
    %c0_4 = arith.constant 0 : index
    %3 = vector.load %arg3[%c0_3, %c0_4] : memref<1x2048xf32, #tpu.memory_space<vmem>>, vector<1x2048xf32>
    %4 = vector.broadcast %3 : vector<1x2048xf32> to vector<16x2048xf32>
    %5 = arith.addf %2, %4 : vector<16x2048xf32>
    %cst_5 = arith.constant 0.000000e+00 : f32
    %6 = vector.broadcast %cst_5 : f32 to vector<16x2048xf32>
    %7 = arith.maximumf %5, %6 : vector<16x2048xf32>
    %c0_6 = arith.constant 0 : index
    %c0_7 = arith.constant 0 : index
    %8 = vector.load %arg4[%c0_6, %c0_7] : memref<2048x32xf32, #tpu.memory_space<vmem>>, vector<2048x32xf32>
    %cst_8 = arith.constant dense<0.000000e+00> : vector<16x32xf32>
    %9 = tpu.matmul %7, %8, %cst_8 {dimension_numbers = #tpu.dot_dimension_numbers<[1], [0], [0], [1], [0, 0, 1, 1], [], []>} : vector<16x2048xf32>, vector<2048x32xf32>, vector<16x32xf32> -> vector<16x32xf32>
    %c0_9 = arith.constant 0 : index
    %c0_10 = arith.constant 0 : index
    %10 = vector.load %arg5[%c0_9, %c0_10] : memref<1x32xf32, #tpu.memory_space<vmem>>, vector<1x32xf32>
    %11 = vector.broadcast %10 : vector<1x32xf32> to vector<16x32xf32>
    %12 = arith.addf %9, %11 : vector<16x32xf32>
    %13 = arith.addf %12, %0 : vector<16x32xf32>
    %cst_11 = arith.constant dense<0.000000e+00> : vector<16xf32>
    %14 = vector.multi_reduction <add>, %13, %cst_11 [1] : vector<16x32xf32> to vector<16xf32>
    %15 = vector.shape_cast %14 : vector<16xf32> to vector<16x1xf32>
    %cst_12 = arith.constant 3.200000e+01 : f32
    %16 = vector.broadcast %cst_12 : f32 to vector<16x1xf32>
    %17 = arith.divf %15, %16 : vector<16x1xf32>
    %18 = vector.broadcast %17 : vector<16x1xf32> to vector<16x32xf32>
    %19 = arith.subf %13, %18 : vector<16x32xf32>
    %20 = arith.mulf %19, %19 : vector<16x32xf32>
    %cst_13 = arith.constant dense<0.000000e+00> : vector<16xf32>
    %21 = vector.multi_reduction <add>, %20, %cst_13 [1] : vector<16x32xf32> to vector<16xf32>
    %22 = vector.shape_cast %21 : vector<16xf32> to vector<16x1xf32>
    %cst_14 = arith.constant 3.100000e+01 : f32
    %23 = vector.broadcast %cst_14 : f32 to vector<16x1xf32>
    %24 = arith.divf %22, %23 : vector<16x1xf32>
    %25 = math.sqrt %24 : vector<16x1xf32>
    %c0_15 = arith.constant 0 : index
    %c0_16 = arith.constant 0 : index
    %26 = vector.load %arg6[%c0_15, %c0_16] : memref<1x32xf32, #tpu.memory_space<vmem>>, vector<1x32xf32>
    %27 = vector.broadcast %17 : vector<16x1xf32> to vector<16x32xf32>
    %28 = arith.subf %13, %27 : vector<16x32xf32>
    %29 = vector.broadcast %26 : vector<1x32xf32> to vector<16x32xf32>
    %30 = arith.mulf %29, %28 : vector<16x32xf32>
    %cst_17 = arith.constant 9.99999997E-7 : f32
    %31 = vector.broadcast %cst_17 : f32 to vector<16x1xf32>
    %32 = arith.addf %25, %31 : vector<16x1xf32>
    %33 = vector.broadcast %32 : vector<16x1xf32> to vector<16x32xf32>
    %34 = arith.divf %30, %33 : vector<16x32xf32>
    %c0_18 = arith.constant 0 : index
    %c0_19 = arith.constant 0 : index
    %35 = vector.load %arg7[%c0_18, %c0_19] : memref<1x32xf32, #tpu.memory_space<vmem>>, vector<1x32xf32>
    %36 = vector.broadcast %35 : vector<1x32xf32> to vector<16x32xf32>
    %37 = arith.addf %34, %36 : vector<16x32xf32>
    %c0_20 = arith.constant 0 : index
    %c0_21 = arith.constant 0 : index
    %38 = vector.load %arg8[%c0_20, %c0_21] : memref<16x32xf32, #tpu.memory_space<vmem>>, vector<16x32xf32>
    tpu.vector_store %arg8[%c0_20, %c0_21], %37 {strides = array<i32>} : memref<16x32xf32, #tpu.memory_space<vmem>>, vector<16x32xf32>,
    return
  }
  func.func @transform_0(%arg0: i32) -> (i32, i32) {
    %c0_i32 = arith.constant 0 : i32
    %c0_i32_0 = arith.constant 0 : i32
    return %arg0, %c0_i32 : i32, i32
  }
  func.func @transform_1(%arg0: i32) -> (i32, i32) {
    %c0_i32 = arith.constant 0 : i32
    %c0_i32_0 = arith.constant 0 : i32
    %c0_i32_1 = arith.constant 0 : i32
    return %c0_i32, %c0_i32_0 : i32, i32
  }
  func.func @transform_2(%arg0: i32) -> (i32, i32) {
    %c0_i32 = arith.constant 0 : i32
    %c0_i32_0 = arith.constant 0 : i32
    %c0_i32_1 = arith.constant 0 : i32
    return %c0_i32, %c0_i32_0 : i32, i32
  }
  func.func @transform_3(%arg0: i32) -> (i32, i32) {
    %c0_i32 = arith.constant 0 : i32
    %c0_i32_0 = arith.constant 0 : i32
    %c0_i32_1 = arith.constant 0 : i32
    return %c0_i32, %c0_i32_0 : i32, i32
  }
  func.func @transform_4(%arg0: i32) -> (i32, i32) {
    %c0_i32 = arith.constant 0 : i32
    %c0_i32_0 = arith.constant 0 : i32
    %c0_i32_1 = arith.constant 0 : i32
    return %c0_i32, %c0_i32_0 : i32, i32
  }
  func.func @transform_5(%arg0: i32) -> (i32, i32) {
    %c0_i32 = arith.constant 0 : i32
    %c0_i32_0 = arith.constant 0 : i32
    %c0_i32_1 = arith.constant 0 : i32
    return %c0_i32, %c0_i32_0 : i32, i32
  }
  func.func @transform_6(%arg0: i32) -> (i32, i32) {
    %c0_i32 = arith.constant 0 : i32
    %c0_i32_0 = arith.constant 0 : i32
    %c0_i32_1 = arith.constant 0 : i32
    return %c0_i32, %c0_i32_0 : i32, i32
  }
  func.func @transform_7(%arg0: i32) -> (i32, i32) {
    %c0_i32 = arith.constant 0 : i32
    %c0_i32_0 = arith.constant 0 : i32
    return %arg0, %c0_i32 : i32, i32
  }
}

</mosaic_0001>

<bundles_post_ra>
// kernel: encoder_layer.2
= control target key start
LH: loop header
LB: loop body
LE: loop exit
PB: predicated region body
PF: predicated region fallthrough
CT: control target
= control target key end

     0   :  { %s1725_s27 = smov 0   ;;  %s1883_s0 = inlined_call_operand.vmem [shape: f32[2,8,32], index: 0, kind: input, shape index: {}]   ;;  %s1884_s1 = inlined_call_operand.vmem [shape: f32[2,1,8], index: 1, kind: input, shape index: {}]   ;;  %s1885_s2 = inlined_call_operand.vmem [shape: f32[32,96], index: 2, kind: input, shape index: {}]   ;;  %s1886_s3 = inlined_call_operand.vmem [shape: f32[1,96], index: 3, kind: input, shape index: {}]   ;;  %s1887_s4 = inlined_call_operand.vmem [shape: f32[32,32], index: 4, kind: input, shape index: {}]   ;;  %s1888_s5 = inlined_call_operand.vmem [shape: f32[1,32], index: 5, kind: input, shape index: {}]   ;;  %s1889_s6 = inlined_call_operand.vmem [shape: f32[1,32], index: 6, kind: input, shape index: {}]   ;;  %s1890_s7 = inlined_call_operand.vmem [shape: f32[1,32], index: 7, kind: input, shape index: {}]   ;;  %s1891_s8 = inlined_call_operand.vmem [shape: f32[2,8,32], index: 8, kind: output, shape index: {}]  }
   0x1 LB: > { %s1480_s28 = sadd.s32 4294967295, %s1664_s27   ;;  %p1484_p0 = scmp.ge.s32.totalorder %s1664_s27, 1  ;;  %s1664_s27 = sphi %s1725_s27, %s18_s27  }
   0x2   : > { %p269_p1 = scmp.lt.s32.totalorder %s1664_s27, 3 }
   0x4   : > { %p270_p2 = pnand %p1484_p0, %p269_p1 }
   0x5   : > { %v319_v0 = vld [vmem:[%s1885_s2] sm:$0xff] (!%p270_p2)  ;;  %v320_v1 = vld [vmem:[%s1885_s2 + $0x8] sm:$0xff] (!%p270_p2)  ;;  %v321_v2 = vld [vmem:[%s1885_s2 + $0x10] sm:$0xff] (!%p270_p2)  ;;  %v1666_v3 = vmov (!%p270_p2), 0.0|0.0   ;;  %vm1667_vm0 = vmmov (!%p270_p2), 0   ;;  %v1668_v6 = vmov (!%p270_p2), 0.0   ;;  %v406_v17 = vlaneseq (!%p270_p2) }
   0x6   : > { %273 = sbr.rel (%p270_p2) target bundleno = 2914 (0xb62), region = 52  ;;  %1610 = vmatprep.subr.bf16.mxu0 (!%p270_p2), %v1666_v3  ;;  %v1611_v4 = vpack.c.bf16 (!%p270_p2), %v320_v1, %v319_v0  ;;  %v322_v5 = vld [vmem:[%s1885_s2 + $0x18] sm:$0xff] (!%p270_p2)  ;;  %1547 = vmatprep.mubr.msk.f32.mxu0 (!%p270_p2), %vm1667_vm0, %v1668_v6  ;;  %p304_p3 = scmp.lt.s32.totalorder (!%p270_p2), %s1480_s28, 1  ;;  %vm330_vm1 = vcmask (!%p270_p2), 261120   ;;  %v1487_v9 = vld [vmem:[%s1886_s3] ss:$0 sm:$0xff] (!%p270_p2) }
   0x7   : > { %1550 = vmatprep.subr.mxu1 (!%p270_p2), %v1668_v6  ;;  %1552 = vmatprep.mubr.msk.f32.mxu1 (!%p270_p2), %vm1667_vm0, %v1668_v6  ;;  %v1614_v7 = vpack.c.bf16 (!%p270_p2), %v322_v5, %v321_v2  ;;  %s1669_s21 = smov (!%p270_p2), 96   ;;  %s1670_s22 = smov (!%p270_p2), 120   ;;  %vm414_vm2 = vcmask (!%p270_p2), 64512   ;;  %v407_v19 = vshrl.u32 (!%p270_p2), %v406_v17, 7  ;;  %v743_v41 = vld [vmem:[%s1887_s4 + $0x8] sm:$0xff] (!%p270_p2)  ;;  %v577_v50 = vld [vmem:[%s1887_s4] sm:$0xff] (!%p270_p2) }
   0x8   : > { %1612 = vmatpush3.bf16.msra.mxu0 (!%p270_p2), %v1611_v4  ;;  %s1671_s23 = smov (!%p270_p2), 88   ;;  %s1672_s29 = smov (!%p270_p2), 56  }
   0x9   : > { %1613 = vmatprep.subr.bf16.mxu0 (!%p270_p2), %v1666_v3  ;;  %v408_v20 = vsub.s32 (!%p270_p2), 0, %v407_v19  ;;  %s1673_s30 = smov (!%p270_p2), 64   ;;  %s1674_s9 = smov (!%p270_p2), 80  }
   0xa   : > { %s1675_s10 = smov (!%p270_p2), 112   ;;  %s1676_s16 = smov (!%p270_p2), 72  }
   0xb   : > { %s1677_s17 = smov (!%p270_p2), 104  }
   0xc   : > { %1615 = vmatpush3.bf16.msra.mxu0 (!%p270_p2), %v1614_v7 }
   0xd   : > { %s1893_s28 = smov (!%p304_p3, %s1480_s28), 1  ;;  %1560 = vmatprep.subr.mxu0 %v1668_v6 }
   0xe   : > { %s1485_s15 = sshll.u32 %s1893_s28, 3  ;;  %s310_s26 = scalar_lea.vmem %s1884_s1, %s1893_s28 }
   0xf   : > { %s307_s18 = scalar_lea.vmem %s1883_s0, %s1485_s15  ;;  %v316_v18 = vld [vmem:[%s310_s26] sm:$0x1]  ;;  %s314_s12 = scalar_lea.vmem %s1891_s8, %s1485_s15 }
  0x10   : > { %v1758_v8 = vld [vmem:[%s307_s18] sm:$0xff]  ;;  %vm317_vm3 = vcmp.eq.f32.partialorder %v316_v18, 0.0  ;;  %s1678_s18 = smov 48  }
  0x11   : > { %1548 = vmatmul.mubr.msk.f32.vlgmr.msra.gmra.mrb[0].mxu0 %vm330_vm1, %v1758_v8  ;;  %v318_v21 = vsel %vm317_vm3, -1e+10, %v1668_v6 }
  0x12   : > { %1562 = vmatprep.mubr.msk.f32.mxu0 %vm1667_vm0, %v1668_v6  ;;  %v1792_v22 = vrot.slane %v318_v21, %v408_v20 }
  0xe4   : > { %v400_v10 = vpop.f32.mrb[0].mxu0 }
  0xe5   : > { %v1768_v11 = vadd.f32 %v1487_v9, %v400_v10  ;;  %v1549_v12 = vpop.f32.mrb[1].mxu0 }
  0xe7   : > { %412 = vrot.lane.b32.xlu0 %v1768_v11, %s1669_s21  ;;  %v1772_v13 = vmul.f32 0.35355338, %v1768_v11  ;;  %s1679_s21 = smov 40  }
  0xe9   : > { %578 = vrot.lane.b32.xlu1 %v1772_v13, %s1670_s22 }
  0xeb   : > { %580 = vrot.lane.b32.xlu0 %v1768_v11, %s1671_s23 }
 0x159   : > { %v413_v14 = vpop.permute.xlu0 %412 }
 0x15a   : > { %1551 = vmatpush3.xpose.msk.msra.mxu1 %vm414_vm2, %v413_v14 }
 0x15b   : > { %1555 = vmatprep.subr.mxu1 %v1668_v6  ;;  %v579_v16 = vpop.permute.xlu1 %578 }
 0x15d   : > { %v581_v15 = vpop.permute.xlu0 %580  ;;  %1553 = vmatmul.mubr.msk.f32.vlgmr.msra.gmra.mrb[0].mxu1 %vm414_vm2, %v1772_v13 }
 0x15e   : > { %1561 = vmatpush3.xpose.msk.msra.mxu0 %vm414_vm2, %v581_v15  ;;  %1557 = vmatprep.mubr.msk.f32.mxu1 %vm1667_vm0, %v1668_v6 }
 0x15f   : > { %1570 = vmatprep.subr.mxu0 %v1668_v6 }
 0x161   : > { %1563 = vmatmul.mubr.msk.f32.vlgmr.msra.gmra.mrb[2].mxu0 %vm414_vm2, %v579_v16  ;;  %v1055_v16 = vld [vmem:[%s1887_s4 + $0x10] sm:$0xff] }
 0x162   : > { %1572 = vmatprep.mubr.msk.f32.mxu0 %vm1667_vm0, %v1668_v6  ;;  %1571 = vmatpush3.msra.mxu0 %v743_v41 }
 0x163   : > { %1580 = vmatprep.subr.mxu0 %v1668_v6 }
 0x230   : > { %v486_v23 = vpop.f32.mrb[0].mxu1 }
 0x231   : > { %v487_v24 = vadd.f32 %v486_v23, %v1792_v22  ;;  %v1554_v25 = vpop.f32.mrb[1].mxu1 }
 0x233   : > { %v490_v26 = vsel %vm414_vm2, %v487_v24, -inf }
 0x234   : > { %491 = vmax.xlane.f32.xlu1 %v490_v26  ;;  %v652_v27 = vpop.f32.mrb[2].mxu0 }
 0x235   : > { %v653_v28 = vadd.f32 %v652_v27, %v1792_v22  ;;  %v1564_v29 = vpop.f32.mrb[3].mxu0 }
 0x237   : > { %v656_v30 = vsel %vm414_vm2, %v653_v28, -inf }
 0x238   : > { %657 = vmax.xlane.f32.xlu0 %v656_v30 }
 0x2c1   : > { %v492_v31 = vpop.xlane.xlu1 %491 }
 0x2c2   : > { %v493_v32 = vsub.f32 %v487_v24, %v492_v31 }
 0x2c4   : > { %v494_v33 = vmul.f32 1.442695, %v493_v32 }
 0x2c5   : > { %v658_v34 = vpop.xlane.xlu0 %657 }
 0x2c6   : > { %1638 = vpow2.f32 %v494_v33  ;;  %v659_v35 = vsub.f32 %v653_v28, %v658_v34 }
 0x2c8   : > { %v660_v36 = vmul.f32 1.442695, %v659_v35 }
 0x2ca   : > { %1640 = vpow2.f32 %v660_v36 }
 0x2d0   : > { %v1639_v37 = vpop.eup %1638 }
 0x2d1   : > { %v496_v38 = vsel %vm414_vm2, %v1639_v37, 0.0 }
 0x2d2   : > { %497 = vadd.xlane.f32.xlu0 %v496_v38 }
 0x2d4   : > { %v1641_v39 = vpop.eup %1640 }
 0x2d5   : > { %v662_v40 = vsel %vm414_vm2, %v1641_v39, 0.0 }
 0x2d6   : > { %663 = vadd.xlane.f32.xlu1 %v662_v40 }
 0x2e7   : > { %667 = vrot.lane.b32.xlu1 %v1768_v11, %s1672_s29 }
 0x2e8   : > { %501 = vrot.lane.b32.xlu0 %v1768_v11, %s1673_s30 }
 0x2eb   : > { %892 = vrot.lane.b32.xlu1 %v1768_v11, %s1674_s9 }
 0x2ec   : > { %890 = vrot.lane.b32.xlu0 %v1772_v13, %s1675_s10 }
 0x35f   : > { %v498_v42 = vpop.xlane.xlu0 %497 }
 0x360   : > { %1642 = vrcp.f32 %v498_v42 }
 0x363   : > { %v664_v43 = vpop.xlane.xlu1 %663  ;;  %v502_v44 = vpop.permute.xlu0 %501 }
 0x364   : > { %1644 = vrcp.f32 %v664_v43  ;;  %1556 = vmatpush3.msra.mxu1 %v502_v44 }
 0x365   : > { %1565 = vmatprep.subr.mxu1 %v1668_v6 }
 0x367   : > { %v668_v47 = vpop.permute.xlu1 %667  ;;  %v891_v56 = vpop.permute.xlu0 %890 }
 0x36a   : > { %v1643_v45 = vpop.eup %1642 }
 0x36b   : > { %v500_v46 = vmul.f32 %v1643_v45, %v1639_v37  ;;  %v893_v54 = vpop.permute.xlu1 %892  ;;  %v1505_v37 = vld [vmem:[%s1888_s5] ss:$0 sm:$0xff] }
 0x36d   : > { %1558 = vmatmul.mubr.msk.f32.vlgmr.msra.gmra.mrb[2].mxu1 %vm414_vm2, %v500_v46 }
 0x36e   : > { %v1645_v48 = vpop.eup %1644  ;;  %1566 = vmatpush3.msra.mxu1 %v668_v47  ;;  %1567 = vmatprep.mubr.msk.f32.mxu1 %vm1667_vm0, %v1668_v6 }
 0x36f   : > { %v666_v49 = vmul.f32 %v1645_v48, %v1641_v39  ;;  %1575 = vmatprep.subr.mxu1 %v1668_v6 }
 0x371   : > { %1568 = vmatmul.mubr.msk.f32.vlgmr.msra.gmra.mrb[4].mxu1 %vm414_vm2, %v666_v49 }
 0x372   : > { %1577 = vmatprep.mubr.msk.f32.mxu1 %vm1667_vm0, %v1668_v6  ;;  %1576 = vmatpush3.msra.mxu1 %v577_v50 }
 0x373   : > { %1585 = vmatprep.subr.mxu1 %v1668_v6 }
 0x440   : > { %v573_v51 = vpop.f32.mrb[2].mxu1 }
 0x441   : > { %v1559_v52 = vpop.f32.mrb[3].mxu1  ;;  %1578 = vmatmul.mubr.msk.f32.vlgmr.msra.gmra.mrb[6].mxu1 %vm414_vm2, %v573_v51 }
 0x442   : > { %1587 = vmatprep.mubr.msk.f32.mxu1 %vm1667_vm0, %v1668_v6 }
 0x444   : > { %v739_v53 = vpop.f32.mrb[4].mxu1 }
 0x445   : > { %v1569_v55 = vpop.f32.mrb[5].mxu1  ;;  %1573 = vmatmul.mubr.msk.f32.vlgmr.msra.gmra.mrb[4].mxu0 %vm414_vm2, %v739_v53 }
 0x446   : > { %1581 = vmatpush3.xpose.msk.msra.mxu0 %vm414_vm2, %v893_v54  ;;  %1582 = vmatprep.mubr.msk.f32.mxu0 %vm1667_vm0, %v1668_v6  ;;  %v1506_v55 = vld [vmem:[%s1889_s6] ss:$0 sm:$0xff] }
 0x447   : > { %1590 = vmatprep.subr.mxu0 %v1668_v6 }
 0x449   : > { %1583 = vmatmul.mubr.msk.f32.vlgmr.msra.gmra.mrb[6].mxu0 %vm414_vm2, %v891_v56 }
 0x44a   : > { %1592 = vmatprep.mubr.msk.f32.mxu0 %vm1667_vm0, %v1668_v6  ;;  %1591 = vmatpush3.msra.mxu0 %v1055_v16 }
 0x44b   : > { %1600 = vmatprep.subr.mxu0 %v1668_v6 }
 0x514   : > { %v886_v57 = vpop.f32.mrb[6].mxu1 }
 0x515   : > { %v1579_v58 = vpop.f32.mrb[7].mxu1 }
 0x516   : > { %v1507_v58 = vld [vmem:[%s1890_s7] ss:$0 sm:$0xff] }
 0x518   : > { %v813_v59 = vpop.f32.mrb[4].mxu0 }
 0x519   : > { %v887_v60 = vadd.f32 %v886_v57, %v813_v59  ;;  %v1574_v61 = vpop.f32.mrb[5].mxu0 }
 0x51c   : > { %v964_v62 = vpop.f32.mrb[6].mxu0 }
 0x51d   : > { %v965_v63 = vadd.f32 %v964_v62, %v1792_v22  ;;  %v1584_v0 = vpop.f32.mrb[7].mxu0 }
 0x51f   : > { %v968_v1 = vsel %vm414_vm2, %v965_v63, -inf }
 0x520   : > { %969 = vmax.xlane.f32.xlu1 %v968_v1 }
 0x531   : > { %1132 = vrot.lane.b32.xlu1 %v1768_v11, %s1676_s16 }
 0x535   : > { %1130 = vrot.lane.b32.xlu1 %v1772_v13, %s1677_s17 }
 0x5ad   : > { %v970_v2 = vpop.xlane.xlu1 %969 }
 0x5ae   : > { %v971_v3 = vsub.f32 %v965_v63, %v970_v2 }
 0x5b0   : > { %v972_v4 = vmul.f32 1.442695, %v971_v3 }
 0x5b1   : > { %v1133_v14 = vpop.permute.xlu1 %1132 }
 0x5b2   : > { %1646 = vpow2.f32 %v972_v4 }
 0x5b5   : > { %v1131_v15 = vpop.permute.xlu1 %1130 }
 0x5bc   : > { %v1647_v5 = vpop.eup %1646 }
 0x5bd   : > { %v974_v7 = vsel %vm414_vm2, %v1647_v5, 0.0 }
 0x5be   : > { %975 = vadd.xlane.f32.xlu0 %v974_v7 }
 0x5d4   : > { %979 = vrot.lane.b32.xlu0 %v1768_v11, %s1678_s18 }
 0x64b   : > { %v976_v9 = vpop.xlane.xlu0 %975 }
 0x64c   : > { %1648 = vrcp.f32 %v976_v9 }
 0x64f   : > { %v980_v10 = vpop.permute.xlu0 %979 }
 0x650   : > { %1586 = vmatpush3.msra.mxu1 %v980_v10 }
 0x651   : > { %1595 = vmatprep.subr.mxu1 %v1668_v6 }
 0x656   : > { %v1649_v12 = vpop.eup %1648 }
 0x657   : > { %v978_v13 = vmul.f32 %v1649_v12, %v1647_v5 }
 0x659   : > { %1588 = vmatmul.mubr.msk.f32.vlgmr.msra.gmra.mrb[8].mxu1 %vm414_vm2, %v978_v13 }
 0x65a   : > { %1596 = vmatpush3.xpose.msk.msra.mxu1 %vm414_vm2, %v1133_v14  ;;  %1597 = vmatprep.mubr.msk.f32.mxu1 %vm1667_vm0, %v1668_v6 }
 0x65b   : > { %1605 = vmatprep.subr.mxu1 %v1668_v6 }
 0x65d   : > { %1598 = vmatmul.mubr.msk.f32.vlgmr.msra.gmra.mrb[10].mxu1 %vm414_vm2, %v1131_v15 }
 0x65e   : > { %1607 = vmatprep.mubr.msk.f32.mxu1 %vm1667_vm0, %v1668_v6 }
 0x72c   : > { %v1051_v17 = vpop.f32.mrb[8].mxu1 }
 0x72d   : > { %v1589_v18 = vpop.f32.mrb[9].mxu1  ;;  %1593 = vmatmul.mubr.msk.f32.vlgmr.msra.gmra.mrb[8].mxu0 %vm414_vm2, %v1051_v17 }
 0x72e   : > { %1602 = vmatprep.mubr.msk.f32.mxu0 %vm1667_vm0, %v1668_v6  ;;  %v1295_v6 = vld [vmem:[%s1887_s4 + $0x18] sm:$0xff] }
 0x72f   : > { %1606 = vmatpush3.msra.mxu1 %v1295_v6 }
 0x730   : > { %v1204_v19 = vpop.f32.mrb[10].mxu1 }
 0x731   : > { %v1205_v20 = vadd.f32 %v1204_v19, %v1792_v22  ;;  %v1599_v21 = vpop.f32.mrb[11].mxu1 }
 0x733   : > { %v1208_v23 = vsel %vm414_vm2, %v1205_v20, -inf }
 0x734   : > { %1209 = vmax.xlane.f32.xlu0 %v1208_v23 }
 0x74a   : > { %1219 = vrot.lane.b32.xlu0 %v1768_v11, %s1679_s21 }
 0x7c1   : > { %v1210_v24 = vpop.xlane.xlu0 %1209 }
 0x7c2   : > { %v1211_v25 = vsub.f32 %v1205_v20, %v1210_v24 }
 0x7c4   : > { %v1212_v26 = vmul.f32 1.442695, %v1211_v25 }
 0x7c5   : > { %v1220_v27 = vpop.permute.xlu0 %1219 }
 0x7c6   : > { %1650 = vpow2.f32 %v1212_v26  ;;  %1601 = vmatpush3.msra.mxu0 %v1220_v27 }
 0x7d0   : > { %v1651_v28 = vpop.eup %1650 }
 0x7d1   : > { %v1214_v29 = vsel %vm414_vm2, %v1651_v28, 0.0 }
 0x7d2   : > { %1215 = vadd.xlane.f32.xlu1 %v1214_v29 }
 0x800   : > { %v1125_v22 = vpop.f32.mrb[8].mxu0 }
 0x801   : > { %v1129_v30 = vadd.f32 %v1125_v22, %v887_v60  ;;  %v1594_v31 = vpop.f32.mrb[9].mxu0 }
 0x85f   : > { %v1216_v32 = vpop.xlane.xlu1 %1215 }
 0x860   : > { %1652 = vrcp.f32 %v1216_v32 }
 0x86a   : > { %v1653_v11 = vpop.eup %1652 }
 0x86b   : > { %v1218_v33 = vmul.f32 %v1653_v11, %v1651_v28 }
 0x86d   : > { %1603 = vmatmul.mubr.msk.f32.vlgmr.msra.gmra.mrb[10].mxu0 %vm414_vm2, %v1218_v33 }
 0x940   : > { %v1291_v34 = vpop.f32.mrb[10].mxu0 }
 0x941   : > { %v1604_v35 = vpop.f32.mrb[11].mxu0  ;;  %1608 = vmatmul.mubr.msk.f32.vlgmr.msra.gmra.mrb[12].mxu1 %vm414_vm2, %v1291_v34 }
 0xa14   : > { %v1365_v36 = vpop.f32.mrb[12].mxu1 }
 0xa15   : > { %v1369_v38 = vadd.f32 %v1365_v36, %v1129_v30  ;;  %v1609_v39 = vpop.f32.mrb[13].mxu1 }
 0xa17   : > { %v1377_v40 = vadd.f32 %v1505_v37, %v1369_v38 }
 0xa19   : > { %v1378_v41 = vadd.f32 %v1377_v40, %v1758_v8 }
 0xa1b   : > { %v1379_v42 = vsel %vm330_vm1, %v1378_v41, 0.0 }
 0xa1c   : > { %1380 = vadd.xlane.f32.xlu1 %v1379_v42 }
 0xaa9   : > { %v1381_v43 = vpop.xlane.xlu1 %1380 }
 0xaaa   : > { %v1383_v44 = vmul.f32 0.03125, %v1381_v43 }
 0xaac   : > { %v1384_v45 = vsub.f32 %v1378_v41, %v1383_v44 }
 0xaae   : > { %v1385_v46 = vmul.f32 %v1384_v45, %v1384_v45  ;;  %v1405_v56 = vmul.f32 %v1506_v55, %v1384_v45 }
 0xab0   : > { %v1386_v47 = vsel %vm330_vm1, %v1385_v46, 0.0 }
 0xab1   : > { %1387 = vadd.xlane.f32.xlu1 %v1386_v47 }
 0xb3e   : > { %v1388_v48 = vpop.xlane.xlu1 %1387 }
 0xb3f   : > { %v1390_v49 = vmul.f32 0.032258064, %v1388_v48 }
 0xb41   : > { %1654 = vrsqrt.f32 %v1390_v49  ;;  %vm1393_vm4 = vcmp.eq.f32.partialorder %v1390_v49, inf  ;;  %v1396_v52 = vand.u32 2147483648, %v1390_v49  ;;  %vm1395_vm5 = vcmp.eq.f32.partialorder %v1390_v49, 0.0 }
 0xb4b   : > { %v1655_v50 = vpop.eup %1654 }
 0xb4c   : > { %v1392_v51 = vmul.f32 %v1655_v50, %v1390_v49 }
 0xb4e   : > { %v1394_v53 = vsel %vm1393_vm4, %v1390_v49, %v1392_v51 }
 0xb4f   : > { %v1397_v8 = vsel %vm1395_vm5, %v1396_v52, %v1394_v53 }
 0xb50   : > { %v1406_v54 = vadd.f32 1e-06, %v1397_v8 }
 0xb52   : > { %1656 = vrcp.f32 %v1406_v54 }
 0xb5c   : > { %v1657_v57 = vpop.eup %1656 }
 0xb5d   : > { %v1408_v59 = vmul.f32 %v1657_v57, %v1405_v56 }
 0xb5f   : > { %v1416_v60 = vadd.f32 %v1507_v58, %v1408_v59 }
 0xb61   : > { %1417 = vst.msk [vmem:[%s314_s12] sm:$0xff] %vm330_vm1, %v1416_v60 }
 0xb62 PF: > { %s18_s27 = sadd.s32 1, %s1664_s27  }
 0xb63   : > { %p15_p4 = scmp.ge.s32.totalorder %s18_s27, 4  }
 0xb65   :  { %17 = sbr.rel (!%p15_p4) target bundleno = 1 (0x1), region = 85 }

// kernel: encoder_layer.3
= control target key start
LH: loop header
LB: loop body
LE: loop exit
PB: predicated region body
PF: predicated region fallthrough
CT: control target
= control target key end

     0   :  { %v2456_v7 = vmov 0.0   ;;  %vm177_vm0 = vcmask 261120   ;;  %s3693_s0 = inlined_call_operand.vmem [shape: f32[16,32], index: 0, kind: input, shape index: {}]   ;;  %s3694_s1 = inlined_call_operand.vmem [shape: f32[32,2048], index: 1, kind: input, shape index: {}]   ;;  %s3695_s2 = inlined_call_operand.vmem [shape: f32[1,2048], index: 2, kind: input, shape index: {}]   ;;  %s3696_s3 = inlined_call_operand.vmem [shape: f32[2048,32], index: 3, kind: input, shape index: {}]   ;;  %s3697_s4 = inlined_call_operand.vmem [shape: f32[1,32], index: 4, kind: input, shape index: {}]   ;;  %s3698_s5 = inlined_call_operand.vmem [shape: f32[1,32], index: 5, kind: input, shape index: {}]   ;;  %s3699_s6 = inlined_call_operand.vmem [shape: f32[1,32], index: 6, kind: input, shape index: {}]   ;;  %s3700_s7 = inlined_call_operand.hbm [shape: f32[16,32], index: 7, kind: output, shape index: {}]  }
   0x1   :  { %v30_v0 = vld [vmem:[%s3694_s1 + $0x8] sm:$0xff]  ;;  %v32_v2 = vld [vmem:[%s3694_s1 + $0x18] sm:$0xff]  ;;  %v29_v5 = vld [vmem:[%s3694_s1] sm:$0xff]  ;;  %248 = vmatprep.mubr.f32.mxu0 %v2456_v7  ;;  %325 = vmatprep.mubr.f32.mxu1 %v2456_v7 }
   0x2   :  { %v46_v1 = vld [vmem:[%s3694_s1 + $0x88] sm:$0xff]  ;;  %v48_v4 = vld [vmem:[%s3694_s1 + $0x98] sm:$0xff]  ;;  %v45_v6 = vld [vmem:[%s3694_s1 + $0x80] sm:$0xff] }
   0x3   :  { %v2098_v3 = vpack.c.bf16 %v46_v1, %v30_v0  ;;  %v2106_v8 = vpack.c.bf16 %v48_v4, %v32_v2  ;;  %v2100_v9 = vpack.c.bf16 %v45_v6, %v29_v5  ;;  %v31_v10 = vld [vmem:[%s3694_s1 + $0x10] sm:$0xff]  ;;  %v62_v12 = vld [vmem:[%s3694_s1 + $0x108] sm:$0xff]  ;;  %v64_v15 = vld [vmem:[%s3694_s1 + $0x118] sm:$0xff] }
   0x4   :  { %v47_v11 = vld [vmem:[%s3694_s1 + $0x90] sm:$0xff]  ;;  %v78_v14 = vld [vmem:[%s3694_s1 + $0x188] sm:$0xff]  ;;  %v80_v16 = vld [vmem:[%s3694_s1 + $0x198] sm:$0xff] }
   0x5   :  { %2099 = vmatprep.subr.bf16.mxu0 %v2098_v3  ;;  %v2108_v13 = vpack.c.bf16 %v47_v11, %v31_v10  ;;  %2107 = vmatprep.subr.bf16.mxu1 %v2106_v8  ;;  %v2102_v17 = vpack.c.bf16 %v78_v14, %v62_v12  ;;  %v2110_v18 = vpack.c.bf16 %v80_v16, %v64_v15  ;;  %v61_v19 = vld [vmem:[%s3694_s1 + $0x100] sm:$0xff]  ;;  %v63_v21 = vld [vmem:[%s3694_s1 + $0x110] sm:$0xff]  ;;  %v34_v24 = vld [vmem:[%s3694_s1 + $0x28] sm:$0xff] }
   0x6   :  { %2101 = vmatpush1.bf16.msra.mxu0 %v2100_v9  ;;  %v77_v20 = vld [vmem:[%s3694_s1 + $0x180] sm:$0xff]  ;;  %v79_v23 = vld [vmem:[%s3694_s1 + $0x190] sm:$0xff]  ;;  %v50_v26 = vld [vmem:[%s3694_s1 + $0xa8] sm:$0xff] }
   0x7   :  { %2109 = vmatpush1.bf16.msra.mxu1 %v2108_v13  ;;  %v2104_v22 = vpack.c.bf16 %v77_v20, %v61_v19  ;;  %2103 = vmatprep.subr.bf16.mxu0 %v2102_v17  ;;  %v2112_v25 = vpack.c.bf16 %v79_v23, %v63_v21  ;;  %v36_v27 = vld [vmem:[%s3694_s1 + $0x38] sm:$0xff]  ;;  %v2114_v29 = vpack.c.bf16 %v50_v26, %v34_v24  ;;  %v33_v31 = vld [vmem:[%s3694_s1 + $0x20] sm:$0xff]  ;;  %v35_v33 = vld [vmem:[%s3694_s1 + $0x30] sm:$0xff] }
   0x8   :  { %2111 = vmatprep.subr.bf16.mxu1 %v2110_v18  ;;  %v52_v28 = vld [vmem:[%s3694_s1 + $0xb8] sm:$0xff]  ;;  %v49_v32 = vld [vmem:[%s3694_s1 + $0xa0] sm:$0xff]  ;;  %v51_v35 = vld [vmem:[%s3694_s1 + $0xb0] sm:$0xff] }
   0x9   :  { %v2122_v30 = vpack.c.bf16 %v52_v28, %v36_v27  ;;  %v2574_v34 = vld [vmem:[%s3693_s0] sm:$0xff]  ;;  %v66_v36 = vld [vmem:[%s3694_s1 + $0x128] sm:$0xff]  ;;  %v2116_v37 = vpack.c.bf16 %v49_v32, %v33_v31  ;;  %v2124_v38 = vpack.c.bf16 %v51_v35, %v35_v33  ;;  %v68_v40 = vld [vmem:[%s3694_s1 + $0x138] sm:$0xff] }
   0xa   :  { %2105 = vmatpush1.bf16.msra.mxu0 %v2104_v22  ;;  %v82_v39 = vld [vmem:[%s3694_s1 + $0x1a8] sm:$0xff]  ;;  %v84_v41 = vld [vmem:[%s3694_s1 + $0x1b8] sm:$0xff]  ;;  %v65_v43 = vld [vmem:[%s3694_s1 + $0x120] sm:$0xff] }
   0xb   :  { %2113 = vmatpush1.bf16.msra.mxu1 %v2112_v25  ;;  %2115 = vmatprep.subr.bf16.mxu0 %v2114_v29  ;;  %v2118_v42 = vpack.c.bf16 %v82_v39, %v66_v36  ;;  %v81_v44 = vld [vmem:[%s3694_s1 + $0x1a0] sm:$0xff]  ;;  %v67_v45 = vld [vmem:[%s3694_s1 + $0x130] sm:$0xff]  ;;  %v2126_v46 = vpack.c.bf16 %v84_v41, %v68_v40  ;;  %v38_v48 = vld [vmem:[%s3694_s1 + $0x48] sm:$0xff] }
   0xc   :  { %2123 = vmatprep.subr.bf16.mxu1 %v2122_v30  ;;  %v83_v47 = vld [vmem:[%s3694_s1 + $0x1b0] sm:$0xff]  ;;  %v54_v49 = vld [vmem:[%s3694_s1 + $0xc8] sm:$0xff]  ;;  %v40_v51 = vld [vmem:[%s3694_s1 + $0x58] sm:$0xff]  ;;  %v2120_v53 = vpack.c.bf16 %v81_v44, %v65_v43 }
   0xd   :  { %1775 = vmatmul.mubr.msk.f32.vlgmr.msra.gmra.mrb[0].mxu0 %vm177_vm0, %v2574_v34  ;;  %v2617_v50 = vld [vmem:[%s3693_s0 + $0x8] sm:$0xff]  ;;  %v56_v52 = vld [vmem:[%s3694_s1 + $0xd8] sm:$0xff]  ;;  %v2128_v54 = vpack.c.bf16 %v83_v47, %v67_v45  ;;  %v2130_v55 = vpack.c.bf16 %v54_v49, %v38_v48  ;;  %v37_v56 = vld [vmem:[%s3694_s1 + $0x40] sm:$0xff] }
   0xe   :  { %1777 = vmatmul.mubr.msk.f32.vlgmr.msra.gmra.mrb[0].mxu1 %vm177_vm0, %v2574_v34  ;;  %254 = vmatprep.mubr.f32.mxu0 %v2456_v7  ;;  %v53_v57 = vld [vmem:[%s3694_s1 + $0xc0] sm:$0xff]  ;;  %v2138_v58 = vpack.c.bf16 %v56_v52, %v40_v51  ;;  %v39_v59 = vld [vmem:[%s3694_s1 + $0x50] sm:$0xff]  ;;  %v70_v61 = vld [vmem:[%s3694_s1 + $0x148] sm:$0xff] }
   0xf   :  { %2117 = vmatpush1.bf16.msra.mxu0 %v2116_v37  ;;  %2125 = vmatpush1.bf16.msra.mxu1 %v2124_v38  ;;  %v55_v60 = vld [vmem:[%s3694_s1 + $0xd0] sm:$0xff]  ;;  %v86_v62 = vld [vmem:[%s3694_s1 + $0x1c8] sm:$0xff]  ;;  %v72_v63 = vld [vmem:[%s3694_s1 + $0x158] sm:$0xff]  ;;  %v2132_v1 = vpack.c.bf16 %v53_v57, %v37_v56 }
  0x10   :  { %331 = vmatprep.mubr.f32.mxu1 %v2456_v7  ;;  %2119 = vmatprep.subr.bf16.mxu0 %v2118_v42  ;;  %v88_v0 = vld [vmem:[%s3694_s1 + $0x1d8] sm:$0xff]  ;;  %v2140_v2 = vpack.c.bf16 %v55_v60, %v39_v59  ;;  %v69_v3 = vld [vmem:[%s3694_s1 + $0x140] sm:$0xff]  ;;  %v2134_v5 = vpack.c.bf16 %v86_v62, %v70_v61  ;;  %v71_v8 = vld [vmem:[%s3694_s1 + $0x150] sm:$0xff] }
  0x11   :  { %1776 = vmatmul.mubr.msk.f32.gmra.mrb[2].mxu0 %vm177_vm0, %v2617_v50  ;;  %2127 = vmatprep.subr.bf16.mxu1 %v2126_v46  ;;  %v85_v4 = vld [vmem:[%s3694_s1 + $0x1c0] sm:$0xff]  ;;  %v2142_v6 = vpack.c.bf16 %v88_v0, %v72_v63  ;;  %v87_v9 = vld [vmem:[%s3694_s1 + $0x1d0] sm:$0xff]  ;;  %v42_v10 = vld [vmem:[%s3694_s1 + $0x68] sm:$0xff] }
  0x12   :  { %1778 = vmatmul.mubr.msk.f32.gmra.mrb[2].mxu1 %vm177_vm0, %v2617_v50  ;;  %402 = vmatprep.mubr.f32.mxu0 %v2456_v7  ;;  %v58_v11 = vld [vmem:[%s3694_s1 + $0xe8] sm:$0xff]  ;;  %v44_v12 = vld [vmem:[%s3694_s1 + $0x78] sm:$0xff]  ;;  %v2136_v14 = vpack.c.bf16 %v85_v4, %v69_v3  ;;  %v2144_v15 = vpack.c.bf16 %v87_v9, %v71_v8  ;;  %v41_v17 = vld [vmem:[%s3694_s1 + $0x60] sm:$0xff] }
  0x13   :  { %2121 = vmatpush1.bf16.msra.mxu0 %v2120_v53  ;;  %2129 = vmatpush1.bf16.msra.mxu1 %v2128_v54  ;;  %v60_v13 = vld [vmem:[%s3694_s1 + $0xf8] sm:$0xff]  ;;  %v2146_v16 = vpack.c.bf16 %v58_v11, %v42_v10  ;;  %v57_v18 = vld [vmem:[%s3694_s1 + $0xe0] sm:$0xff]  ;;  %v43_v20 = vld [vmem:[%s3694_s1 + $0x70] sm:$0xff] }
  0x14   :  { %479 = vmatprep.mubr.f32.mxu1 %v2456_v7  ;;  %2131 = vmatprep.subr.bf16.mxu0 %v2130_v55  ;;  %v2154_v19 = vpack.c.bf16 %v60_v13, %v44_v12  ;;  %v59_v21 = vld [vmem:[%s3694_s1 + $0xf0] sm:$0xff]  ;;  %v74_v22 = vld [vmem:[%s3694_s1 + $0x168] sm:$0xff]  ;;  %v76_v24 = vld [vmem:[%s3694_s1 + $0x178] sm:$0xff]  ;;  %v2148_v26 = vpack.c.bf16 %v57_v18, %v41_v17 }
  0x15   :  { %2139 = vmatprep.subr.bf16.mxu1 %v2138_v58  ;;  %v90_v23 = vld [vmem:[%s3694_s1 + $0x1e8] sm:$0xff]  ;;  %v92_v25 = vld [vmem:[%s3694_s1 + $0x1f8] sm:$0xff]  ;;  %v2156_v27 = vpack.c.bf16 %v59_v21, %v43_v20  ;;  %v73_v28 = vld [vmem:[%s3694_s1 + $0x160] sm:$0xff] }
  0x16   :  { %1779 = vmatmul.mubr.msk.f32.vlgmr.msra.gmra.mrb[4].mxu0 %vm177_vm0, %v2574_v34  ;;  %1781 = vmatmul.mubr.msk.f32.vlgmr.msra.gmra.mrb[4].mxu1 %vm177_vm0, %v2574_v34  ;;  %v89_v29 = vld [vmem:[%s3694_s1 + $0x1e0] sm:$0xff]  ;;  %v2150_v30 = vpack.c.bf16 %v90_v23, %v74_v22  ;;  %v2158_v31 = vpack.c.bf16 %v92_v25, %v76_v24  ;;  %v75_v32 = vld [vmem:[%s3694_s1 + $0x170] sm:$0xff]  ;;  %v849_v36 = vld [vmem:[%s3696_s3 + $0x88] sm:$0xff] }
  0x17   :  { %408 = vmatprep.mubr.f32.mxu0 %v2456_v7  ;;  %485 = vmatprep.mubr.f32.mxu1 %v2456_v7  ;;  %v91_v33 = vld [vmem:[%s3694_s1 + $0x1f0] sm:$0xff]  ;;  %v848_v35 = vld [vmem:[%s3696_s3 + $0x80] sm:$0xff]  ;;  %v881_v38 = vld [vmem:[%s3696_s3 + $0x188] sm:$0xff]  ;;  %v2152_v39 = vpack.c.bf16 %v89_v29, %v73_v28 }
  0x18   :  { %2133 = vmatpush1.bf16.msra.mxu0 %v2132_v1  ;;  %2141 = vmatpush1.bf16.msra.mxu1 %v2140_v2  ;;  %v880_v37 = vld [vmem:[%s3696_s3 + $0x180] sm:$0xff]  ;;  %v2160_v40 = vpack.c.bf16 %v91_v33, %v75_v32  ;;  %v2162_v41 = vpack.c.bf16 %v849_v36, %v848_v35  ;;  %v833_v44 = vld [vmem:[%s3696_s3 + $0x8] sm:$0xff]  ;;  %v850_v47 = vld [vmem:[%s3696_s3 + $0x90] sm:$0xff] }
  0x19   :  { %2135 = vmatprep.subr.bf16.mxu0 %v2134_v5  ;;  %2143 = vmatprep.subr.bf16.mxu1 %v2142_v6  ;;  %v2194_v42 = vpack.c.bf16 %v881_v38, %v880_v37  ;;  %v832_v43 = vld [vmem:[%s3696_s3] sm:$0xff]  ;;  %v865_v46 = vld [vmem:[%s3696_s3 + $0x108] sm:$0xff]  ;;  %v851_v48 = vld [vmem:[%s3696_s3 + $0x98] sm:$0xff] }
  0x1a   :  { %1780 = vmatmul.mubr.msk.f32.gmra.mrb[6].mxu0 %vm177_vm0, %v2617_v50  ;;  %1782 = vmatmul.mubr.msk.f32.gmra.mrb[6].mxu1 %vm177_vm0, %v2617_v50  ;;  %v864_v45 = vld [vmem:[%s3696_s3 + $0x100] sm:$0xff]  ;;  %v882_v49 = vld [vmem:[%s3696_s3 + $0x190] sm:$0xff]  ;;  %v883_v51 = vld [vmem:[%s3696_s3 + $0x198] sm:$0xff]  ;;  %v2164_v52 = vpack.c.bf16 %v833_v44, %v832_v43  ;;  %v2166_v56 = vpack.c.bf16 %v851_v48, %v850_v47 }
  0x1b   :  { %556 = vmatprep.mubr.f32.mxu0 %v2456_v7  ;;  %633 = vmatprep.mubr.f32.mxu1 %v2456_v7  ;;  %v2196_v53 = vpack.c.bf16 %v865_v46, %v864_v45  ;;  %v834_v54 = vld [vmem:[%s3696_s3 + $0x10] sm:$0xff]  ;;  %v835_v55 = vld [vmem:[%s3696_s3 + $0x18] sm:$0xff]  ;;  %v2198_v57 = vpack.c.bf16 %v883_v51, %v882_v49  ;;  %v852_v60 = vld [vmem:[%s3696_s3 + $0xa0] sm:$0xff] }
  0x1c   :  { %2137 = vmatpush1.bf16.msra.mxu0 %v2136_v14  ;;  %2145 = vmatpush1.bf16.msra.mxu1 %v2144_v15  ;;  %v866_v58 = vld [vmem:[%s3696_s3 + $0x110] sm:$0xff]  ;;  %v867_v59 = vld [vmem:[%s3696_s3 + $0x118] sm:$0xff]  ;;  %v853_v61 = vld [vmem:[%s3696_s3 + $0xa8] sm:$0xff]  ;;  %v2168_v0 = vpack.c.bf16 %v835_v55, %v834_v54 }
  0x1d   :  { %2147 = vmatprep.subr.bf16.mxu0 %v2146_v16  ;;  %2155 = vmatprep.subr.bf16.mxu1 %v2154_v19  ;;  %v884_v62 = vld [vmem:[%s3696_s3 + $0x1a0] sm:$0xff]  ;;  %v885_v63 = vld [vmem:[%s3696_s3 + $0x1a8] sm:$0xff]  ;;  %v2170_v4 = vpack.c.bf16 %v853_v61, %v852_v60  ;;  %v854_v6 = vld [vmem:[%s3696_s3 + $0xb0] sm:$0xff] }
  0x1e   :  { %v836_v1 = vld [vmem:[%s3696_s3 + $0x20] sm:$0xff]  ;;  %v837_v2 = vld [vmem:[%s3696_s3 + $0x28] sm:$0xff] }
  0x1f   :  { %1783 = vmatmul.mubr.msk.f32.vlgmr.msra.gmra.mrb[8].mxu0 %vm177_vm0, %v2574_v34  ;;  %1785 = vmatmul.mubr.msk.f32.vlgmr.msra.gmra.mrb[8].mxu1 %vm177_vm0, %v2574_v34  ;;  %v868_v3 = vld [vmem:[%s3696_s3 + $0x120] sm:$0xff]  ;;  %v869_v5 = vld [vmem:[%s3696_s3 + $0x128] sm:$0xff] }
  0x20   :  { %562 = vmatprep.mubr.f32.mxu0 %v2456_v7  ;;  %639 = vmatprep.mubr.f32.mxu1 %v2456_v7 }
  0x21   :  { %2149 = vmatpush1.bf16.msra.mxu0 %v2148_v26  ;;  %2157 = vmatpush1.bf16.msra.mxu1 %v2156_v27 }
  0x22   :  { %2151 = vmatprep.subr.bf16.mxu0 %v2150_v30  ;;  %2159 = vmatprep.subr.bf16.mxu1 %v2158_v31 }
  0x23   :  { %1784 = vmatmul.mubr.msk.f32.gmra.mrb[10].mxu0 %vm177_vm0, %v2617_v50  ;;  %1786 = vmatmul.mubr.msk.f32.gmra.mrb[10].mxu1 %vm177_vm0, %v2617_v50 }
  0x24   :  { %710 = vmatprep.mubr.f32.mxu0 %v2456_v7  ;;  %787 = vmatprep.mubr.f32.mxu1 %v2456_v7 }
  0x25   :  { %2153 = vmatpush1.bf16.msra.mxu0 %v2152_v39  ;;  %2161 = vmatpush1.bf16.msra.mxu1 %v2160_v40 }
  0x26   :  { %2163 = vmatprep.subr.bf16.mxu0 %v2162_v41  ;;  %2195 = vmatprep.subr.bf16.mxu1 %v2194_v42 }
  0x28   :  { %1787 = vmatmul.mubr.msk.f32.vlgmr.msra.gmra.mrb[12].mxu0 %vm177_vm0, %v2574_v34  ;;  %1789 = vmatmul.mubr.msk.f32.vlgmr.msra.gmra.mrb[12].mxu1 %vm177_vm0, %v2574_v34  ;;  %v2200_v34 = vpack.c.bf16 %v867_v59, %v866_v58 }
  0x29   :  { %716 = vmatprep.mubr.f32.mxu0 %v2456_v7  ;;  %793 = vmatprep.mubr.f32.mxu1 %v2456_v7  ;;  %v2202_v7 = vpack.c.bf16 %v885_v63, %v884_v62 }
  0x2a   :  { %2165 = vmatpush3.bf16.msra.mxu0 %v2164_v52  ;;  %2197 = vmatpush3.bf16.msra.mxu1 %v2196_v53 }
  0x2b   :  { %2167 = vmatprep.subr.bf16.mxu0 %v2166_v56  ;;  %2199 = vmatprep.subr.bf16.mxu1 %v2198_v57 }
  0x2c   :  { %12 = vsyncpa [#allocation3], 0  ;;  %1788 = vmatmul.mubr.msk.f32.gmra.mrb[14].mxu0 %vm177_vm0, %v2617_v50  ;;  %1790 = vmatmul.mubr.msk.f32.gmra.mrb[14].mxu1 %vm177_vm0, %v2617_v50  ;;  %v855_v8 = vld [vmem:[%s3696_s3 + $0xb8] sm:$0xff]  ;;  %v886_v9 = vld [vmem:[%s3696_s3 + $0x1b0] sm:$0xff]  ;;  %v2172_v11 = vpack.c.bf16 %v837_v2, %v836_v1  ;;  %v2204_v12 = vpack.c.bf16 %v869_v5, %v868_v3  ;;  %s2457_s23 = smov [#allocation2]  }
  0x2d   :  { %v887_v10 = vld [vmem:[%s3696_s3 + $0x1b8] sm:$0xff]  ;;  %v838_v50 = vld [vmem:[%s3696_s3 + $0x30] sm:$0xff]  ;;  %v2174_v14 = vpack.c.bf16 %v855_v8, %v854_v6  ;;  %v856_v18 = vld [vmem:[%s3696_s3 + $0xc0] sm:$0xff]  ;;  %s1764_s24 = sshll.u32 %s2457_s23, 4  ;;  %s1765_s24 = int_to_ptr.vmem [resolvable:$true] %s1764_s24 }
  0x2e   :  { %2169 = vmatpush3.bf16.msra.mxu0 %v2168_v0  ;;  %2201 = vmatpush3.bf16.msra.mxu1 %v2200_v34  ;;  %v839_v13 = vld [vmem:[%s3696_s3 + $0x38] sm:$0xff]  ;;  %v2206_v15 = vpack.c.bf16 %v887_v10, %v886_v9  ;;  %v870_v16 = vld [vmem:[%s3696_s3 + $0x130] sm:$0xff]  ;;  %v857_v19 = vld [vmem:[%s3696_s3 + $0xc8] sm:$0xff]  ;;  %p2437_p1 = scmp.lt.s32.totalorder %s1765_s24, %s1765_s24 }
  0x2f   :  { %2171 = vmatprep.subr.bf16.mxu0 %v2170_v4  ;;  %2203 = vmatprep.subr.bf16.mxu1 %v2202_v7  ;;  %v871_v17 = vld [vmem:[%s3696_s3 + $0x138] sm:$0xff]  ;;  %v888_v20 = vld [vmem:[%s3696_s3 + $0x1c0] sm:$0xff]  ;;  %v889_v21 = vld [vmem:[%s3696_s3 + $0x1c8] sm:$0xff]  ;;  %v2176_v22 = vpack.c.bf16 %v839_v13, %v838_v50  ;;  %v2178_v26 = vpack.c.bf16 %v857_v19, %v856_v18 }
  0x30   :  { %v2208_v23 = vpack.c.bf16 %v871_v17, %v870_v16  ;;  %v840_v24 = vld [vmem:[%s3696_s3 + $0x40] sm:$0xff]  ;;  %v841_v25 = vld [vmem:[%s3696_s3 + $0x48] sm:$0xff]  ;;  %v2210_v27 = vpack.c.bf16 %v889_v21, %v888_v20  ;;  %v858_v30 = vld [vmem:[%s3696_s3 + $0xd0] sm:$0xff] }
  0x31   :  { %v872_v28 = vld [vmem:[%s3696_s3 + $0x140] sm:$0xff]  ;;  %v873_v29 = vld [vmem:[%s3696_s3 + $0x148] sm:$0xff]  ;;  %v859_v31 = vld [vmem:[%s3696_s3 + $0xd8] sm:$0xff]  ;;  %v2180_v35 = vpack.c.bf16 %v841_v25, %v840_v24 }
  0x32   :  { %2173 = vmatpush3.bf16.msra.mxu0 %v2172_v11  ;;  %2205 = vmatpush3.bf16.msra.mxu1 %v2204_v12  ;;  %v890_v32 = vld [vmem:[%s3696_s3 + $0x1d0] sm:$0xff]  ;;  %v891_v33 = vld [vmem:[%s3696_s3 + $0x1d8] sm:$0xff]  ;;  %v2212_v36 = vpack.c.bf16 %v873_v29, %v872_v28  ;;  %v2182_v39 = vpack.c.bf16 %v859_v31, %v858_v30  ;;  %v860_v43 = vld [vmem:[%s3696_s3 + $0xe0] sm:$0xff]  ;;  %v97_v11 = vlaneseq }
  0x33   :  { %2175 = vmatprep.subr.bf16.mxu0 %v2174_v14  ;;  %2207 = vmatprep.subr.bf16.mxu1 %v2206_v15  ;;  %v842_v37 = vld [vmem:[%s3696_s3 + $0x50] sm:$0xff]  ;;  %v843_v38 = vld [vmem:[%s3696_s3 + $0x58] sm:$0xff]  ;;  %v2214_v40 = vpack.c.bf16 %v891_v33, %v890_v32  ;;  %v861_v44 = vld [vmem:[%s3696_s3 + $0xe8] sm:$0xff] }
  0x34   :  { %v874_v41 = vld [vmem:[%s3696_s3 + $0x150] sm:$0xff]  ;;  %v875_v42 = vld [vmem:[%s3696_s3 + $0x158] sm:$0xff]  ;;  %v892_v45 = vld [vmem:[%s3696_s3 + $0x1e0] sm:$0xff]  ;;  %v2184_v47 = vpack.c.bf16 %v843_v38, %v842_v37  ;;  %v2186_v51 = vpack.c.bf16 %v861_v44, %v860_v43  ;;  %v2954_v12 = vshrl.u32 %v97_v11, 7 }
  0x35   :  { %v893_v46 = vld [vmem:[%s3696_s3 + $0x1e8] sm:$0xff]  ;;  %v2216_v48 = vpack.c.bf16 %v875_v42, %v874_v41  ;;  %v844_v49 = vld [vmem:[%s3696_s3 + $0x60] sm:$0xff]  ;;  %v862_v58 = vld [vmem:[%s3696_s3 + $0xf0] sm:$0xff] }
  0x36   :  { %2177 = vmatpush3.bf16.msra.mxu0 %v2176_v22  ;;  %2209 = vmatpush3.bf16.msra.mxu1 %v2208_v23  ;;  %v2218_v52 = vpack.c.bf16 %v893_v46, %v892_v45  ;;  %v845_v53 = vld [vmem:[%s3696_s3 + $0x68] sm:$0xff]  ;;  %v876_v54 = vld [vmem:[%s3696_s3 + $0x160] sm:$0xff]  ;;  %v863_v59 = vld [vmem:[%s3696_s3 + $0xf8] sm:$0xff]  ;;  %v99_v50 = vsub.s32 0, %v2954_v12  ;;  %v107_v14 = vsub.s32 2, %v2954_v12  ;;  %v103_v15 = vsub.s32 1, %v2954_v12 }
  0x37   :  { %2179 = vmatprep.subr.bf16.mxu0 %v2178_v26  ;;  %2211 = vmatprep.subr.bf16.mxu1 %v2210_v27  ;;  %v877_v55 = vld [vmem:[%s3696_s3 + $0x168] sm:$0xff]  ;;  %v2188_v56 = vpack.c.bf16 %v845_v53, %v844_v49  ;;  %v894_v60 = vld [vmem:[%s3696_s3 + $0x1f0] sm:$0xff]  ;;  %v2190_v61 = vpack.c.bf16 %v863_v59, %v862_v58  ;;  %v895_v62 = vld [vmem:[%s3696_s3 + $0x1f8] sm:$0xff]  ;;  %v111_v16 = vsub.s32 3, %v2954_v12  ;;  %v119_v38 = vsub.s32 5, %v2954_v12 }
  0x38   :  { %v2220_v57 = vpack.c.bf16 %v877_v55, %v876_v54  ;;  %v846_v63 = vld [vmem:[%s3696_s3 + $0x70] sm:$0xff]  ;;  %v847_v0 = vld [vmem:[%s3696_s3 + $0x78] sm:$0xff]  ;;  %v2222_v34 = vpack.c.bf16 %v895_v62, %v894_v60  ;;  %v912_v7 = vld [vmem:[%s3696_s3 + $0x280] sm:$0xff] }
  0x39   :  { %v2192_v1 = vpack.c.bf16 %v847_v0, %v846_v63  ;;  %v878_v2 = vld [vmem:[%s3696_s3 + $0x170] sm:$0xff]  ;;  %v879_v3 = vld [vmem:[%s3696_s3 + $0x178] sm:$0xff]  ;;  %v913_v5 = vld [vmem:[%s3696_s3 + $0x288] sm:$0xff] }
  0x3a   :  { %2181 = vmatpush3.bf16.msra.mxu0 %v2180_v35  ;;  %2213 = vmatpush3.bf16.msra.mxu1 %v2212_v36  ;;  %v2224_v4 = vpack.c.bf16 %v879_v3, %v878_v2  ;;  %v944_v6 = vld [vmem:[%s3696_s3 + $0x380] sm:$0xff]  ;;  %v2226_v8 = vpack.c.bf16 %v913_v5, %v912_v7  ;;  %v945_v9 = vld [vmem:[%s3696_s3 + $0x388] sm:$0xff]  ;;  %v914_v32 = vld [vmem:[%s3696_s3 + $0x290] sm:$0xff] }
  0x3b   :  { %2183 = vmatprep.subr.bf16.mxu0 %v2182_v39  ;;  %2215 = vmatprep.subr.bf16.mxu1 %v2214_v40  ;;  %v2258_v10 = vpack.c.bf16 %v945_v9, %v944_v6  ;;  %v2960_v13 = vld [vmem:[%s3695_s2] sm:$0xff]  ;;  %v897_v26 = vld [vmem:[%s3696_s3 + $0x208] sm:$0xff]  ;;  %v915_v33 = vld [vmem:[%s3696_s3 + $0x298] sm:$0xff]  ;;  %v127_v39 = vsub.s32 7, %v2954_v12 }
  0x3c   :  { %v100_v17 = vrot.slane %v2960_v13, %v99_v50  ;;  %v108_v18 = vrot.slane %v2960_v13, %v107_v14  ;;  %v104_v19 = vrot.slane %v2960_v13, %v103_v15  ;;  %v112_v20 = vrot.slane %v2960_v13, %v111_v16  ;;  %v896_v22 = vld [vmem:[%s3696_s3 + $0x200] sm:$0xff]  ;;  %v929_v28 = vld [vmem:[%s3696_s3 + $0x308] sm:$0xff]  ;;  %v946_v36 = vld [vmem:[%s3696_s3 + $0x390] sm:$0xff] }
  0x3d   :  { %v928_v27 = vld [vmem:[%s3696_s3 + $0x300] sm:$0xff]  ;;  %v947_v37 = vld [vmem:[%s3696_s3 + $0x398] sm:$0xff]  ;;  %v2228_v42 = vpack.c.bf16 %v897_v26, %v896_v22  ;;  %v898_v44 = vld [vmem:[%s3696_s3 + $0x210] sm:$0xff]  ;;  %v3035_v2 = vrot.slane %v2960_v13, %v127_v39 }
  0x3e   :  { %2185 = vmatpush3.bf16.msra.mxu0 %v2184_v47  ;;  %2217 = vmatpush3.bf16.msra.mxu1 %v2216_v48  ;;  %v2260_v43 = vpack.c.bf16 %v929_v28, %v928_v27  ;;  %v2230_v48 = vpack.c.bf16 %v915_v33, %v914_v32  ;;  %v899_v49 = vld [vmem:[%s3696_s3 + $0x218] sm:$0xff]  ;;  %v2262_v55 = vpack.c.bf16 %v947_v37, %v946_v36  ;;  %v917_v58 = vld [vmem:[%s3696_s3 + $0x2a8] sm:$0xff]  ;;  %v948_v62 = vld [vmem:[%s3696_s3 + $0x3a0] sm:$0xff] }
  0x3f   :  { %2187 = vmatprep.subr.bf16.mxu0 %v2186_v51  ;;  %2219 = vmatprep.subr.bf16.mxu1 %v2218_v52  ;;  %v930_v51 = vld [vmem:[%s3696_s3 + $0x310] sm:$0xff]  ;;  %v949_v63 = vld [vmem:[%s3696_s3 + $0x3a8] sm:$0xff]  ;;  %v2232_v3 = vpack.c.bf16 %v899_v49, %v898_v44  ;;  %v919_v22 = vld [vmem:[%s3696_s3 + $0x2b8] sm:$0xff] }
  0x40   :  { %v901_v9 = vld [vmem:[%s3696_s3 + $0x228] sm:$0xff]  ;;  %v951_v26 = vld [vmem:[%s3696_s3 + $0x3b8] sm:$0xff]  ;;  %v934_v36 = vld [vmem:[%s3696_s3 + $0x330] sm:$0xff] }
  0x41   :  { %v935_v44 = vld [vmem:[%s3696_s3 + $0x338] sm:$0xff]  ;;  %v952_v49 = vld [vmem:[%s3696_s3 + $0x3c0] sm:$0xff] }
  0x42   :  { %2189 = vmatpush3.bf16.msra.mxu0 %v2188_v56  ;;  %2221 = vmatpush3.bf16.msra.mxu1 %v2220_v57  ;;  %v931_v56 = vld [vmem:[%s3696_s3 + $0x318] sm:$0xff]  ;;  %v916_v57 = vld [vmem:[%s3696_s3 + $0x2a0] sm:$0xff] }
  0x43   :  { %2191 = vmatprep.subr.bf16.mxu0 %v2190_v61  ;;  %2223 = vmatprep.subr.bf16.mxu1 %v2222_v34  ;;  %v2264_v5 = vpack.c.bf16 %v931_v56, %v930_v51  ;;  %v2234_v6 = vpack.c.bf16 %v917_v58, %v916_v57  ;;  %v953_v51 = vld [vmem:[%s3696_s3 + $0x3c8] sm:$0xff]  ;;  %v904_v57 = vld [vmem:[%s3696_s3 + $0x240] sm:$0xff] }
  0x44   :  { %v905_v58 = vld [vmem:[%s3696_s3 + $0x248] sm:$0xff] }
  0x46   :  { %2193 = vmatpush3.bf16.msra.mxu0 %v2192_v1  ;;  %2225 = vmatpush3.bf16.msra.mxu1 %v2224_v4  ;;  %v3030_v1 = vrot.slane %v2960_v13, %v119_v38 }
  0x47   :  { %2227 = vmatprep.subr.bf16.mxu0 %v2226_v8  ;;  %2259 = vmatprep.subr.bf16.mxu1 %v2258_v10  ;;  %v900_v8 = vld [vmem:[%s3696_s3 + $0x220] sm:$0xff] }
  0x48   :  { %v932_v10 = vld [vmem:[%s3696_s3 + $0x320] sm:$0xff] }
  0xe0   :  { %v250_v21 = vpop.f32.mrb[0].mxu0 }
  0xe1   :  { %v251_v23 = vadd.f32 %v250_v21, %v100_v17  ;;  %v327_v24 = vpop.f32.mrb[0].mxu1  ;;  %v252_v25 = vpop.f32.mrb[1].mxu0  ;;  %v918_v21 = vld [vmem:[%s3696_s3 + $0x2b0] sm:$0xff] }
  0xe2   :  { %v328_v29 = vadd.f32 %v327_v24, %v108_v18  ;;  %v253_v30 = vadd.f32 %v252_v25, %v104_v19  ;;  %v329_v31 = vpop.f32.mrb[1].mxu1  ;;  %v950_v25 = vld [vmem:[%s3696_s3 + $0x3b0] sm:$0xff]  ;;  %v2238_v33 = vpack.c.bf16 %v919_v22, %v918_v21  ;;  %v924_v22 = vld [vmem:[%s3696_s3 + $0x2e0] sm:$0xff] }
  0xe3   :  { %v330_v35 = vadd.f32 %v329_v31, %v112_v20  ;;  %v800_v46 = vmax.f32 %v251_v23, 0.0  ;;  %v3073_v31 = vld [vmem:[%s3695_s2 + $0x8] sm:$0xff] }
  0xe4   :  { %v802_v40 = vmax.f32 %v328_v29, 0.0  ;;  %v801_v41 = vmax.f32 %v253_v30, 0.0  ;;  %v256_v45 = vpop.f32.mrb[2].mxu0  ;;  %v2236_v29 = vpack.c.bf16 %v901_v9, %v900_v8  ;;  %v902_v30 = vld [vmem:[%s3696_s3 + $0x230] sm:$0xff] }
  0xe5   :  { %v803_v47 = vmax.f32 %v330_v35, 0.0  ;;  %v257_v52 = vadd.f32 %v256_v45, %v100_v17  ;;  %v258_v53 = vpop.f32.mrb[3].mxu0  ;;  %v333_v54 = vpop.f32.mrb[2].mxu1  ;;  %v903_v35 = vld [vmem:[%s3696_s3 + $0x238] sm:$0xff]  ;;  %v920_v45 = vld [vmem:[%s3696_s3 + $0x2c0] sm:$0xff]  ;;  %v906_v8 = vld [vmem:[%s3696_s3 + $0x250] sm:$0xff] }
  0xe6   :  { %1159 = vmatprep.mubr.f32.mxu0 %v801_v41  ;;  %v259_v59 = vadd.f32 %v258_v53, %v104_v19  ;;  %v334_v60 = vadd.f32 %v333_v54, %v108_v18  ;;  %v335_v61 = vpop.f32.mrb[3].mxu1  ;;  %v2266_v19 = vpack.c.bf16 %v949_v63, %v948_v62  ;;  %v140_v53 = vrot.slane %v3073_v31, %v107_v14 }
  0xe7   :  { %1234 = vmatprep.mubr.f32.mxu1 %v803_v47  ;;  %1160 = vmatmul.mubr.f32.vlgmr.msra.gmra.mrb[16].mxu0 %v800_v46  ;;  %v816_v0 = vmax.f32 %v257_v52, 0.0  ;;  %v336_v34 = vadd.f32 %v335_v61, %v112_v20  ;;  %v933_v20 = vld [vmem:[%s3696_s3 + $0x328] sm:$0xff]  ;;  %v132_v52 = vrot.slane %v3073_v31, %v99_v50  ;;  %v2240_v54 = vpack.c.bf16 %v903_v35, %v902_v30  ;;  %v936_v50 = vld [vmem:[%s3696_s3 + $0x340] sm:$0xff]  ;;  %v923_v61 = vld [vmem:[%s3696_s3 + $0x2d8] sm:$0xff] }
  0xe8   :  { %1235 = vmatmul.mubr.f32.vlgmr.msra.gmra.mrb[16].mxu1 %v802_v40  ;;  %2229 = vmatpush3.bf16.msra.mxu0 %v2228_v42  ;;  %v817_v4 = vmax.f32 %v259_v59, 0.0  ;;  %v818_v7 = vmax.f32 %v334_v60, 0.0  ;;  %v2268_v32 = vpack.c.bf16 %v933_v20, %v932_v10  ;;  %v921_v46 = vld [vmem:[%s3696_s3 + $0x2c8] sm:$0xff]  ;;  %v2274_v14 = vpack.c.bf16 %v953_v51, %v952_v49  ;;  %v922_v60 = vld [vmem:[%s3696_s3 + $0x2d0] sm:$0xff]  ;;  %v939_v20 = vld [vmem:[%s3696_s3 + $0x358] sm:$0xff] }
  0xe9   :  { %2261 = vmatpush3.bf16.msra.mxu1 %v2260_v43  ;;  %2231 = vmatprep.subr.bf16.mxu0 %v2230_v48  ;;  %v819_v11 = vmax.f32 %v336_v34, 0.0  ;;  %v3046_v17 = vpop.f32.mrb[4].mxu0  ;;  %v3048_v18 = vpop.f32.mrb[4].mxu1  ;;  %v2270_v43 = vpack.c.bf16 %v951_v26, %v950_v25  ;;  %v2242_v56 = vpack.c.bf16 %v921_v46, %v920_v45  ;;  %v937_v59 = vld [vmem:[%s3696_s3 + $0x348] sm:$0xff]  ;;  %v955_v34 = vld [vmem:[%s3696_s3 + $0x3d8] sm:$0xff]  ;;  %v2246_v10 = vpack.c.bf16 %v923_v61, %v922_v60  ;;  %v940_v49 = vld [vmem:[%s3696_s3 + $0x360] sm:$0xff] }
  0xea   :  { %2263 = vmatprep.subr.bf16.mxu1 %v2262_v55  ;;  %1164 = vmatprep.mubr.f32.mxu0 %v817_v4  ;;  %v406_v23 = vpop.f32.mrb[5].mxu0  ;;  %v483_v24 = vpop.f32.mrb[5].mxu1  ;;  %v2272_v55 = vpack.c.bf16 %v935_v44, %v934_v36  ;;  %v2276_v9 = vpack.c.bf16 %v937_v59, %v936_v50  ;;  %v123_v25 = vsub.s32 6, %v2954_v12  ;;  %v941_v51 = vld [vmem:[%s3696_s3 + $0x368] sm:$0xff]  ;;  %v910_v50 = vld [vmem:[%s3696_s3 + $0x270] sm:$0xff] }
  0xeb   :  { %v407_v27 = vadd.f32 %v406_v23, %v3030_v1  ;;  %v484_v28 = vadd.f32 %v483_v24, %v3035_v2  ;;  %1165 = vmatmul.mubr.f32.gmra.mrb[18].mxu0 %v816_v0  ;;  %1239 = vmatprep.mubr.f32.mxu1 %v819_v11  ;;  %v954_v0 = vld [vmem:[%s3696_s3 + $0x3d0] sm:$0xff]  ;;  %v907_v11 = vld [vmem:[%s3696_s3 + $0x258] sm:$0xff]  ;;  %v925_v23 = vld [vmem:[%s3696_s3 + $0x2e8] sm:$0xff]  ;;  %v115_v24 = vsub.s32 4, %v2954_v12  ;;  %v2284_v61 = vpack.c.bf16 %v941_v51, %v940_v49 }
  0xec   :  { %2233 = vmatpush3.bf16.msra.mxu0 %v2232_v3  ;;  %1240 = vmatmul.mubr.f32.gmra.mrb[18].mxu1 %v818_v7  ;;  %v2278_v21 = vpack.c.bf16 %v955_v34, %v954_v0  ;;  %v2248_v36 = vpack.c.bf16 %v907_v11, %v906_v8  ;;  %v156_v45 = vrot.slane %v3073_v31, %v123_v25  ;;  %v943_v0 = vld [vmem:[%s3696_s3 + $0x378] sm:$0xff]  ;;  %v977_v11 = vld [vmem:[%s3696_s3 + $0x488] sm:$0xff]  ;;  %v960_v49 = vld [vmem:[%s3696_s3 + $0x400] sm:$0xff] }
  0xed   :  { %2265 = vmatpush3.bf16.msra.mxu1 %v2264_v5  ;;  %2235 = vmatprep.subr.bf16.mxu0 %v2234_v6  ;;  %v805_v37 = vmax.f32 %v407_v27, 0.0  ;;  %v807_v40 = vmax.f32 %v484_v28, 0.0  ;;  %v3081_v41 = vpop.f32.mrb[6].mxu0  ;;  %v3083_v42 = vpop.f32.mrb[6].mxu1  ;;  %v2244_v6 = vpack.c.bf16 %v905_v58, %v904_v57  ;;  %v956_v28 = vld [vmem:[%s3696_s3 + $0x3e0] sm:$0xff]  ;;  %v148_v44 = vrot.slane %v3073_v31, %v115_v24  ;;  %v963_v12 = vld [vmem:[%s3696_s3 + $0x418] sm:$0xff] }
  0xee   :  { %2267 = vmatprep.subr.bf16.mxu1 %v2266_v19  ;;  %v3094_v47 = vpop.f32.mrb[7].mxu0  ;;  %v3096_v48 = vpop.f32.mrb[7].mxu1  ;;  %v938_v19 = vld [vmem:[%s3696_s3 + $0x350] sm:$0xff]  ;;  %v2250_v46 = vpack.c.bf16 %v925_v23, %v924_v22  ;;  %v116_v57 = vrot.slane %v2960_v13, %v115_v24  ;;  %v124_v60 = vrot.slane %v2960_v13, %v123_v25  ;;  %v1008_v25 = vld [vmem:[%s3696_s3 + $0x580] sm:$0xff] }
  0xef   :  { %1309 = vmatprep.mubr.f32.mxu0 %v805_v37  ;;  %1384 = vmatprep.mubr.f32.mxu1 %v807_v40  ;;  %v2280_v37 = vpack.c.bf16 %v939_v20, %v938_v19  ;;  %v908_v40 = vld [vmem:[%s3696_s3 + $0x260] sm:$0xff] }
  0xf0   :  { %2237 = vmatpush3.bf16.msra.mxu0 %v2236_v29  ;;  %v957_v29 = vld [vmem:[%s3696_s3 + $0x3e8] sm:$0xff]  ;;  %v405_v22 = vadd.f32 %v3046_v17, %v116_v57 }
  0xf1   :  { %2269 = vmatpush3.bf16.msra.mxu1 %v2268_v32  ;;  %2239 = vmatprep.subr.bf16.mxu0 %v2238_v33 }
  0xf2   :  { %2271 = vmatprep.subr.bf16.mxu1 %v2270_v43  ;;  %v558_v62 = vpop.f32.mrb[8].mxu0  ;;  %v635_v63 = vpop.f32.mrb[8].mxu1  ;;  %v909_v43 = vld [vmem:[%s3696_s3 + $0x268] sm:$0xff] }
  0xf3   :  { %v3134_v3 = vadd.f32 %v558_v62, %v132_v52  ;;  %v3136_v4 = vadd.f32 %v635_v63, %v140_v53  ;;  %v3138_v7 = vpop.f32.mrb[9].mxu0  ;;  %v3140_v5 = vpop.f32.mrb[9].mxu1  ;;  %v2252_v58 = vpack.c.bf16 %v909_v43, %v908_v40  ;;  %v911_v62 = vld [vmem:[%s3696_s3 + $0x278] sm:$0xff]  ;;  %v942_v63 = vld [vmem:[%s3696_s3 + $0x370] sm:$0xff] }
  0xf4   :  { %2241 = vmatpush3.bf16.msra.mxu0 %v2240_v54  ;;  %v2282_v54 = vpack.c.bf16 %v957_v29, %v956_v28  ;;  %v2256_v23 = vpack.c.bf16 %v911_v62, %v910_v50  ;;  %v2288_v24 = vpack.c.bf16 %v943_v0, %v942_v63  ;;  %v482_v29 = vadd.f32 %v3048_v18, %v124_v60  ;;  %v961_v18 = vld [vmem:[%s3696_s3 + $0x408] sm:$0xff] }
  0xf5   :  { %2273 = vmatpush3.bf16.msra.mxu1 %v2272_v55  ;;  %2243 = vmatprep.subr.bf16.mxu0 %v2242_v56  ;;  %v926_v55 = vld [vmem:[%s3696_s3 + $0x2f0] sm:$0xff]  ;;  %v927_v56 = vld [vmem:[%s3696_s3 + $0x2f8] sm:$0xff] }
  0xf6   :  { %2275 = vmatprep.subr.bf16.mxu1 %v2274_v14  ;;  %v564_v26 = vpop.f32.mrb[10].mxu0  ;;  %v641_v27 = vpop.f32.mrb[10].mxu1  ;;  %v2254_v13 = vpack.c.bf16 %v927_v56, %v926_v55  ;;  %v411_v55 = vadd.f32 %v3081_v41, %v116_v57  ;;  %v490_v56 = vadd.f32 %v3096_v48, %v3035_v2  ;;  %v806_v41 = vmax.f32 %v482_v29, 0.0  ;;  %v1014_v29 = vld [vmem:[%s3696_s3 + $0x5b0] sm:$0xff] }
  0xf7   :  { %v3168_v30 = vadd.f32 %v564_v26, %v132_v52  ;;  %v3170_v32 = vpop.f32.mrb[11].mxu0  ;;  %v3172_v33 = vadd.f32 %v641_v27, %v140_v53  ;;  %v3174_v35 = vpop.f32.mrb[11].mxu1  ;;  %v152_v52 = vrot.slane %v3073_v31, %v119_v38  ;;  %v160_v53 = vrot.slane %v3073_v31, %v127_v39  ;;  %v958_v38 = vld [vmem:[%s3696_s3 + $0x3f0] sm:$0xff]  ;;  %v959_v39 = vld [vmem:[%s3696_s3 + $0x3f8] sm:$0xff]  ;;  %v1009_v26 = vld [vmem:[%s3696_s3 + $0x588] sm:$0xff] }
  0xf8   :  { %2245 = vmatpush3.bf16.msra.mxu0 %v2244_v6  ;;  %v488_v2 = vadd.f32 %v3083_v42, %v124_v60  ;;  %v2292_v48 = vpack.c.bf16 %v961_v18, %v960_v49  ;;  %v980_v60 = vld [vmem:[%s3696_s3 + $0x4a0] sm:$0xff]  ;;  %v820_v63 = vmax.f32 %v411_v55, 0.0  ;;  %v823_v0 = vmax.f32 %v490_v56, 0.0  ;;  %v966_v18 = vld [vmem:[%s3696_s3 + $0x430] sm:$0xff]  ;;  %v985_v55 = vld [vmem:[%s3696_s3 + $0x4c8] sm:$0xff] }
  0xf9   :  { %2277 = vmatpush3.bf16.msra.mxu1 %v2276_v9  ;;  %2247 = vmatprep.subr.bf16.mxu0 %v2246_v10  ;;  %v976_v10 = vld [vmem:[%s3696_s3 + $0x480] sm:$0xff] }
  0xfa   :  { %2279 = vmatprep.subr.bf16.mxu1 %v2278_v21  ;;  %v2286_v21 = vpack.c.bf16 %v959_v39, %v958_v38  ;;  %v1010_v38 = vld [vmem:[%s3696_s3 + $0x590] sm:$0xff]  ;;  %v1011_v39 = vld [vmem:[%s3696_s3 + $0x598] sm:$0xff]  ;;  %v1016_v56 = vld [vmem:[%s3696_s3 + $0x5c0] sm:$0xff] }
  0xfb   :  { %v712_v14 = vpop.f32.mrb[12].mxu0  ;;  %v789_v59 = vpop.f32.mrb[12].mxu1  ;;  %v2326_v42 = vpack.c.bf16 %v1011_v39, %v1010_v38 }
  0xfc   :  { %2249 = vmatpush3.bf16.msra.mxu0 %v2248_v36  ;;  %v3222_v34 = vadd.f32 %v712_v14, %v148_v44  ;;  %v714_v6 = vpop.f32.mrb[13].mxu0  ;;  %v3224_v8 = vadd.f32 %v789_v59, %v156_v45  ;;  %v791_v9 = vpop.f32.mrb[13].mxu1  ;;  %v2290_v36 = vpack.c.bf16 %v977_v11, %v976_v10  ;;  %v962_v14 = vld [vmem:[%s3696_s3 + $0x410] sm:$0xff]  ;;  %v995_v59 = vld [vmem:[%s3696_s3 + $0x518] sm:$0xff]  ;;  %v822_v10 = vmax.f32 %v488_v2, 0.0  ;;  %v968_v2 = vld [vmem:[%s3696_s3 + $0x440] sm:$0xff] }
  0xfd   :  { %2281 = vmatpush3.bf16.msra.mxu1 %v2280_v37  ;;  %2251 = vmatprep.subr.bf16.mxu0 %v2250_v46  ;;  %v3232_v19 = vadd.f32 %v714_v6, %v152_v52  ;;  %v3234_v20 = vadd.f32 %v791_v9, %v160_v53  ;;  %v413_v46 = vadd.f32 %v3094_v47, %v3030_v1  ;;  %v993_v1 = vld [vmem:[%s3696_s3 + $0x508] sm:$0xff]  ;;  %v978_v47 = vld [vmem:[%s3696_s3 + $0x490] sm:$0xff]  ;;  %v1012_v6 = vld [vmem:[%s3696_s3 + $0x5a0] sm:$0xff] }
  0xfe   :  { %2283 = vmatprep.subr.bf16.mxu1 %v2282_v54  ;;  %v992_v54 = vld [vmem:[%s3696_s3 + $0x500] sm:$0xff]  ;;  %v1013_v9 = vld [vmem:[%s3696_s3 + $0x5a8] sm:$0xff]  ;;  %v2296_v11 = vpack.c.bf16 %v963_v12, %v962_v14  ;;  %v986_v12 = vld [vmem:[%s3696_s3 + $0x4d0] sm:$0xff] }
  0xff   :  { %v718_v27 = vpop.f32.mrb[14].mxu0  ;;  %v795_v28 = vpop.f32.mrb[14].mxu1  ;;  %v821_v57 = vmax.f32 %v413_v46, 0.0  ;;  %v2324_v50 = vpack.c.bf16 %v993_v1, %v992_v54  ;;  %v998_v54 = vld [vmem:[%s3696_s3 + $0x530] sm:$0xff]  ;;  %v1001_v14 = vld [vmem:[%s3696_s3 + $0x548] sm:$0xff] }
 0x100   :  { %2253 = vmatpush3.bf16.msra.mxu0 %v2252_v58  ;;  %v3244_v37 = vadd.f32 %v718_v27, %v148_v44  ;;  %v720_v40 = vpop.f32.mrb[15].mxu0  ;;  %v3246_v17 = vadd.f32 %v795_v28, %v156_v45  ;;  %v797_v43 = vpop.f32.mrb[15].mxu1  ;;  %v2322_v45 = vpack.c.bf16 %v1009_v26, %v1008_v25  ;;  %v979_v58 = vld [vmem:[%s3696_s3 + $0x498] sm:$0xff]  ;;  %v997_v25 = vld [vmem:[%s3696_s3 + $0x528] sm:$0xff]  ;;  %v982_v26 = vld [vmem:[%s3696_s3 + $0x4b0] sm:$0xff] }
 0x101   :  { %2285 = vmatpush3.bf16.msra.mxu1 %v2284_v61  ;;  %2255 = vmatprep.subr.bf16.mxu0 %v2254_v13  ;;  %v3256_v51 = vadd.f32 %v720_v40, %v152_v52  ;;  %v3258_v44 = vadd.f32 %v797_v43, %v160_v53  ;;  %v3272_v52 = vrot.slane %v3073_v31, %v103_v15  ;;  %v804_v53 = vmax.f32 %v405_v22, 0.0  ;;  %v981_v61 = vld [vmem:[%s3696_s3 + $0x4a8] sm:$0xff]  ;;  %v964_v22 = vld [vmem:[%s3696_s3 + $0x420] sm:$0xff]  ;;  %v983_v27 = vld [vmem:[%s3696_s3 + $0x4b8] sm:$0xff] }
 0x102   :  { %2287 = vmatprep.subr.bf16.mxu1 %v2286_v21  ;;  %v3289_v15 = vrot.slane %v3073_v31, %v111_v16  ;;  %v994_v16 = vld [vmem:[%s3696_s3 + $0x510] sm:$0xff]  ;;  %v2294_v31 = vpack.c.bf16 %v979_v58, %v978_v47  ;;  %v2298_v21 = vpack.c.bf16 %v981_v61, %v980_v60  ;;  %v2302_v49 = vpack.c.bf16 %v983_v27, %v982_v26  ;;  %v999_v47 = vld [vmem:[%s3696_s3 + $0x538] sm:$0xff]  ;;  %v1017_v58 = vld [vmem:[%s3696_s3 + $0x5c8] sm:$0xff] }
 0x103   :  { %v561_v62 = vadd.f32 %v3138_v7, %v3272_v52  ;;  %v2328_v7 = vpack.c.bf16 %v995_v59, %v994_v16  ;;  %v2336_v39 = vpack.c.bf16 %v999_v47, %v998_v54  ;;  %v987_v16 = vld [vmem:[%s3696_s3 + $0x4d8] sm:$0xff]  ;;  %v1005_v27 = vld [vmem:[%s3696_s3 + $0x568] sm:$0xff]  ;;  %v1006_v54 = vld [vmem:[%s3696_s3 + $0x570] sm:$0xff] }
 0x104   :  { %2257 = vmatpush3.bf16.msra.mxu0 %v2256_v23  ;;  %v638_v13 = vadd.f32 %v3140_v5, %v3289_v15  ;;  %v965_v23 = vld [vmem:[%s3696_s3 + $0x428] sm:$0xff]  ;;  %v996_v5 = vld [vmem:[%s3696_s3 + $0x520] sm:$0xff]  ;;  %v2310_v61 = vpack.c.bf16 %v987_v16, %v986_v12  ;;  %v1007_v47 = vld [vmem:[%s3696_s3 + $0x578] sm:$0xff]  ;;  %v644_v16 = vadd.f32 %v3174_v35, %v3289_v15 }
 0x105   :  { %2289 = vmatpush3.bf16.msra.mxu1 %v2288_v24  ;;  %2291 = vmatprep.subr.bf16.mxu0 %v2290_v36  ;;  %v2330_v24 = vpack.c.bf16 %v1013_v9, %v1012_v6  ;;  %v809_v28 = vmax.f32 %v561_v62, 0.0  ;;  %v1015_v36 = vld [vmem:[%s3696_s3 + $0x5b8] sm:$0xff]  ;;  %v2300_v43 = vpack.c.bf16 %v965_v23, %v964_v22  ;;  %v2332_v46 = vpack.c.bf16 %v997_v25, %v996_v5  ;;  %v970_v62 = vld [vmem:[%s3696_s3 + $0x450] sm:$0xff]  ;;  %v972_v5 = vld [vmem:[%s3696_s3 + $0x460] sm:$0xff] }
 0x106   :  { %2323 = vmatprep.subr.bf16.mxu1 %v2322_v45  ;;  %v811_v40 = vmax.f32 %v638_v13, 0.0  ;;  %v967_v45 = vld [vmem:[%s3696_s3 + $0x438] sm:$0xff]  ;;  %v2334_v1 = vpack.c.bf16 %v1015_v36, %v1014_v29  ;;  %v988_v13 = vld [vmem:[%s3696_s3 + $0x4e0] sm:$0xff]  ;;  %v1022_v36 = vld [vmem:[%s3696_s3 + $0x5f0] sm:$0xff] }
 0x107   :  { %1310 = vmatmul.mubr.f32.vlgmr.msra.gmra.mrb[20].mxu0 %v804_v53  ;;  %v984_v53 = vld [vmem:[%s3696_s3 + $0x4c0] sm:$0xff]  ;;  %v2304_v38 = vpack.c.bf16 %v967_v45, %v966_v18  ;;  %v1003_v9 = vld [vmem:[%s3696_s3 + $0x558] sm:$0xff]  ;;  %v974_v18 = vld [vmem:[%s3696_s3 + $0x470] sm:$0xff] }
 0x108   :  { %1385 = vmatmul.mubr.f32.vlgmr.msra.gmra.mrb[20].mxu1 %v806_v41  ;;  %2293 = vmatpush3.bf16.msra.mxu0 %v2292_v48  ;;  %v2306_v41 = vpack.c.bf16 %v985_v55, %v984_v53  ;;  %v969_v48 = vld [vmem:[%s3696_s3 + $0x448] sm:$0xff]  ;;  %v1004_v25 = vld [vmem:[%s3696_s3 + $0x560] sm:$0xff]  ;;  %v991_v29 = vld [vmem:[%s3696_s3 + $0x4f8] sm:$0xff] }
 0x109   :  { %2325 = vmatpush3.bf16.msra.mxu1 %v2324_v50  ;;  %1314 = vmatprep.mubr.f32.mxu0 %v821_v57  ;;  %v1000_v57 = vld [vmem:[%s3696_s3 + $0x540] sm:$0xff]  ;;  %v2338_v50 = vpack.c.bf16 %v1017_v58, %v1016_v56  ;;  %v2308_v59 = vpack.c.bf16 %v969_v48, %v968_v2  ;;  %v975_v45 = vld [vmem:[%s3696_s3 + $0x478] sm:$0xff]  ;;  %v1041_v55 = vld [vmem:[%s3696_s3 + $0x688] sm:$0xff] }
 0x10a   :  { %2295 = vmatprep.subr.bf16.mxu0 %v2294_v31  ;;  %2327 = vmatprep.subr.bf16.mxu1 %v2326_v42  ;;  %v1018_v31 = vld [vmem:[%s3696_s3 + $0x5d0] sm:$0xff]  ;;  %v1019_v42 = vld [vmem:[%s3696_s3 + $0x5d8] sm:$0xff]  ;;  %v2340_v60 = vpack.c.bf16 %v1001_v14, %v1000_v57  ;;  %v1040_v53 = vld [vmem:[%s3696_s3 + $0x680] sm:$0xff] }
 0x10b   :  { %1315 = vmatmul.mubr.f32.gmra.mrb[22].mxu0 %v820_v63  ;;  %1389 = vmatprep.mubr.f32.mxu1 %v823_v0  ;;  %v971_v63 = vld [vmem:[%s3696_s3 + $0x458] sm:$0xff]  ;;  %v1002_v0 = vld [vmem:[%s3696_s3 + $0x550] sm:$0xff]  ;;  %v2342_v6 = vpack.c.bf16 %v1019_v42, %v1018_v31  ;;  %v1072_v56 = vld [vmem:[%s3696_s3 + $0x780] sm:$0xff]  ;;  %v2354_v2 = vpack.c.bf16 %v1041_v55, %v1040_v53 }
 0x10c   :  { %2297 = vmatpush3.bf16.msra.mxu0 %v2296_v11  ;;  %1390 = vmatmul.mubr.f32.gmra.mrb[22].mxu1 %v822_v10  ;;  %v989_v10 = vld [vmem:[%s3696_s3 + $0x4e8] sm:$0xff]  ;;  %v1020_v11 = vld [vmem:[%s3696_s3 + $0x5e0] sm:$0xff]  ;;  %v2344_v22 = vpack.c.bf16 %v1003_v9, %v1002_v0  ;;  %v1043_v31 = vld [vmem:[%s3696_s3 + $0x698] sm:$0xff] }
 0x10d   :  { %2329 = vmatpush3.bf16.msra.mxu1 %v2328_v7  ;;  %2299 = vmatprep.subr.bf16.mxu0 %v2298_v21  ;;  %v1021_v7 = vld [vmem:[%s3696_s3 + $0x5e8] sm:$0xff]  ;;  %v2312_v21 = vpack.c.bf16 %v971_v63, %v970_v62  ;;  %v2314_v23 = vpack.c.bf16 %v989_v10, %v988_v13  ;;  %v1024_v48 = vld [vmem:[%s3696_s3 + $0x600] sm:$0xff]  ;;  %v1074_v42 = vld [vmem:[%s3696_s3 + $0x790] sm:$0xff]  ;;  %v824_v10 = vmax.f32 %v3168_v30, 0.0 }
 0x10e   :  { %2331 = vmatprep.subr.bf16.mxu1 %v2330_v24  ;;  %1459 = vmatprep.mubr.f32.mxu0 %v809_v28  ;;  %v973_v24 = vld [vmem:[%s3696_s3 + $0x468] sm:$0xff]  ;;  %v2346_v26 = vpack.c.bf16 %v1021_v7, %v1020_v11  ;;  %v990_v28 = vld [vmem:[%s3696_s3 + $0x4f0] sm:$0xff]  ;;  %v1056_v14 = vld [vmem:[%s3696_s3 + $0x700] sm:$0xff]  ;;  %v827_v11 = vmax.f32 %v644_v16, 0.0 }
 0x10f   :  { %1534 = vmatprep.mubr.f32.mxu1 %v811_v40  ;;  %v1023_v40 = vld [vmem:[%s3696_s3 + $0x5f8] sm:$0xff]  ;;  %v1073_v58 = vld [vmem:[%s3696_s3 + $0x788] sm:$0xff]  ;;  %v1026_v15 = vld [vmem:[%s3696_s3 + $0x610] sm:$0xff] }
 0x110   :  { %2301 = vmatpush3.bf16.msra.mxu0 %v2300_v43  ;;  %v2316_v43 = vpack.c.bf16 %v973_v24, %v972_v5  ;;  %v1025_v57 = vld [vmem:[%s3696_s3 + $0x608] sm:$0xff]  ;;  %v1027_v62 = vld [vmem:[%s3696_s3 + $0x618] sm:$0xff]  ;;  %v1058_v63 = vld [vmem:[%s3696_s3 + $0x710] sm:$0xff] }
 0x111   :  { %2333 = vmatpush3.bf16.msra.mxu1 %v2332_v46  ;;  %2303 = vmatprep.subr.bf16.mxu0 %v2302_v49  ;;  %v2348_v46 = vpack.c.bf16 %v1005_v27, %v1004_v25  ;;  %v2318_v49 = vpack.c.bf16 %v991_v29, %v990_v28  ;;  %v1057_v12 = vld [vmem:[%s3696_s3 + $0x708] sm:$0xff]  ;;  %v1044_v9 = vld [vmem:[%s3696_s3 + $0x6a0] sm:$0xff]  ;;  %v1046_v28 = vld [vmem:[%s3696_s3 + $0x6b0] sm:$0xff] }
 0x112   :  { %2335 = vmatprep.subr.bf16.mxu1 %v2334_v1  ;;  %v2350_v1 = vpack.c.bf16 %v1023_v40, %v1022_v36  ;;  %v2388_v35 = vpack.c.bf16 %v1057_v12, %v1056_v14  ;;  %v1045_v13 = vld [vmem:[%s3696_s3 + $0x6a8] sm:$0xff]  ;;  %v1076_v7 = vld [vmem:[%s3696_s3 + $0x7a0] sm:$0xff]  ;;  %v1047_v29 = vld [vmem:[%s3696_s3 + $0x6b8] sm:$0xff]  ;;  %v813_v36 = vmax.f32 %v3232_v19, 0.0 }
 0x113   :  { %v2362_v24 = vpack.c.bf16 %v1045_v13, %v1044_v9  ;;  %v1028_v30 = vld [vmem:[%s3696_s3 + $0x620] sm:$0xff]  ;;  %v1029_v25 = vld [vmem:[%s3696_s3 + $0x628] sm:$0xff]  ;;  %v1078_v40 = vld [vmem:[%s3696_s3 + $0x7b0] sm:$0xff] }
 0x114   :  { %2305 = vmatpush3.bf16.msra.mxu0 %v2304_v38  ;;  %v2320_v38 = vpack.c.bf16 %v975_v45, %v974_v18  ;;  %v1061_v27 = vld [vmem:[%s3696_s3 + $0x728] sm:$0xff]  ;;  %v2366_v45 = vpack.c.bf16 %v1047_v29, %v1046_v28  ;;  %v1030_v19 = vld [vmem:[%s3696_s3 + $0x630] sm:$0xff]  ;;  %v1048_v53 = vld [vmem:[%s3696_s3 + $0x6c0] sm:$0xff] }
 0x115   :  { %2337 = vmatpush3.bf16.msra.mxu1 %v2336_v39  ;;  %2307 = vmatprep.subr.bf16.mxu0 %v2306_v41  ;;  %v2352_v39 = vpack.c.bf16 %v1007_v47, %v1006_v54  ;;  %v567_v41 = vadd.f32 %v3170_v32, %v3272_v52  ;;  %v1042_v32 = vld [vmem:[%s3696_s3 + $0x690] sm:$0xff]  ;;  %v808_v52 = vmax.f32 %v3134_v3, 0.0  ;;  %v1031_v54 = vld [vmem:[%s3696_s3 + $0x638] sm:$0xff]  ;;  %v1049_v55 = vld [vmem:[%s3696_s3 + $0x6c8] sm:$0xff] }
 0x116   :  { %2339 = vmatprep.subr.bf16.mxu1 %v2338_v50  ;;  %v2386_v50 = vpack.c.bf16 %v1073_v58, %v1072_v56  ;;  %v1063_v47 = vld [vmem:[%s3696_s3 + $0x738] sm:$0xff]  ;;  %v1080_v56 = vld [vmem:[%s3696_s3 + $0x7c0] sm:$0xff]  ;;  %v1081_v58 = vld [vmem:[%s3696_s3 + $0x7c8] sm:$0xff] }
 0x117   :  { %v825_v3 = vmax.f32 %v567_v41, 0.0  ;;  %v2370_v41 = vpack.c.bf16 %v1049_v55, %v1048_v53  ;;  %v1065_v14 = vld [vmem:[%s3696_s3 + $0x748] sm:$0xff]  ;;  %v1050_v12 = vld [vmem:[%s3696_s3 + $0x6d0] sm:$0xff]  ;;  %v1083_v16 = vld [vmem:[%s3696_s3 + $0x7d8] sm:$0xff] }
 0x118   :  { %2309 = vmatpush3.bf16.msra.mxu0 %v2308_v59  ;;  %v1075_v59 = vld [vmem:[%s3696_s3 + $0x798] sm:$0xff] }
 0x119   :  { %2341 = vmatpush3.bf16.msra.mxu1 %v2340_v60  ;;  %2311 = vmatprep.subr.bf16.mxu0 %v2310_v61  ;;  %v810_v60 = vmax.f32 %v3136_v4, 0.0  ;;  %v2356_v61 = vpack.c.bf16 %v1025_v57, %v1024_v48  ;;  %v2358_v4 = vpack.c.bf16 %v1043_v31, %v1042_v32  ;;  %v2390_v0 = vpack.c.bf16 %v1075_v59, %v1074_v42  ;;  %v1033_v48 = vld [vmem:[%s3696_s3 + $0x648] sm:$0xff]  ;;  %v1064_v57 = vld [vmem:[%s3696_s3 + $0x740] sm:$0xff]  ;;  %v1051_v32 = vld [vmem:[%s3696_s3 + $0x6d8] sm:$0xff] }
 0x11a   :  { %2343 = vmatprep.subr.bf16.mxu1 %v2342_v6  ;;  %v1059_v6 = vld [vmem:[%s3696_s3 + $0x718] sm:$0xff]  ;;  %v2404_v42 = vpack.c.bf16 %v1065_v14, %v1064_v57  ;;  %v2374_v59 = vpack.c.bf16 %v1051_v32, %v1050_v12 }
 0x11b   :  { %v2392_v5 = vpack.c.bf16 %v1059_v6, %v1058_v63  ;;  %v1053_v63 = vld [vmem:[%s3696_s3 + $0x6e8] sm:$0xff]  ;;  %v1039_v28 = vld [vmem:[%s3696_s3 + $0x678] sm:$0xff] }
 0x11c   :  { %2313 = vmatpush3.bf16.msra.mxu0 %v2312_v21  ;;  %v1077_v21 = vld [vmem:[%s3696_s3 + $0x7a8] sm:$0xff] }
 0x11d   :  { %2345 = vmatpush3.bf16.msra.mxu1 %v2344_v22  ;;  %2315 = vmatprep.subr.bf16.mxu0 %v2314_v23  ;;  %v826_v22 = vmax.f32 %v3172_v33, 0.0  ;;  %v2360_v23 = vpack.c.bf16 %v1027_v62, %v1026_v15  ;;  %v2394_v33 = vpack.c.bf16 %v1077_v21, %v1076_v7  ;;  %v1067_v15 = vld [vmem:[%s3696_s3 + $0x758] sm:$0xff]  ;;  %v1052_v62 = vld [vmem:[%s3696_s3 + $0x6e0] sm:$0xff] }
 0x11e   :  { %2347 = vmatprep.subr.bf16.mxu1 %v2346_v26  ;;  %v1060_v26 = vld [vmem:[%s3696_s3 + $0x720] sm:$0xff]  ;;  %v2378_v13 = vpack.c.bf16 %v1053_v63, %v1052_v62 }
 0x11f   :  { %v2396_v18 = vpack.c.bf16 %v1061_v27, %v1060_v26  ;;  %v1068_v7 = vld [vmem:[%s3696_s3 + $0x760] sm:$0xff]  ;;  %v1038_v27 = vld [vmem:[%s3696_s3 + $0x670] sm:$0xff] }
 0x120   :  { %2317 = vmatpush3.bf16.msra.mxu0 %v2316_v43  ;;  %v1079_v43 = vld [vmem:[%s3696_s3 + $0x7b8] sm:$0xff] }
 0x121   :  { %2349 = vmatpush3.bf16.msra.mxu1 %v2348_v46  ;;  %2319 = vmatprep.subr.bf16.mxu0 %v2318_v49  ;;  %v815_v46 = vmax.f32 %v3234_v20, 0.0  ;;  %v2364_v49 = vpack.c.bf16 %v1029_v25, %v1028_v30  ;;  %v2398_v20 = vpack.c.bf16 %v1079_v43, %v1078_v40  ;;  %v1087_v30 = vld [vmem:[%s3696_s3 + $0x7f8] sm:$0xff]  ;;  %v2384_v43 = vpack.c.bf16 %v1039_v28, %v1038_v27 }
 0x122   :  { %2351 = vmatprep.subr.bf16.mxu1 %v2350_v1  ;;  %v1062_v1 = vld [vmem:[%s3696_s3 + $0x730] sm:$0xff]  ;;  %v1071_v40 = vld [vmem:[%s3696_s3 + $0x778] sm:$0xff] }
 0x124   :  { %2321 = vmatpush3.bf16.msra.mxu0 %v2320_v38  ;;  %v2368_v38 = vpack.c.bf16 %v1031_v54, %v1030_v19  ;;  %v831_v19 = vmax.f32 %v3258_v44, 0.0  ;;  %v830_v54 = vmax.f32 %v3246_v17, 0.0 }
 0x125   :  { %2353 = vmatpush3.bf16.msra.mxu1 %v2352_v39  ;;  %2355 = vmatprep.subr.bf16.mxu0 %v2354_v2  ;;  %v2400_v39 = vpack.c.bf16 %v1063_v47, %v1062_v1  ;;  %v1032_v2 = vld [vmem:[%s3696_s3 + $0x640] sm:$0xff]  ;;  %v828_v1 = vmax.f32 %v3244_v37, 0.0 }
 0x126   :  { %2387 = vmatprep.subr.bf16.mxu1 %v2386_v50  ;;  %v2402_v50 = vpack.c.bf16 %v1081_v58, %v1080_v56  ;;  %v2372_v31 = vpack.c.bf16 %v1033_v48, %v1032_v2 }
 0x127   :  { %1460 = vmatmul.mubr.f32.vlgmr.msra.gmra.mrb[24].mxu0 %v808_v52  ;;  %v1082_v52 = vld [vmem:[%s3696_s3 + $0x7d0] sm:$0xff] }
 0x128   :  { %1535 = vmatmul.mubr.f32.vlgmr.msra.gmra.mrb[24].mxu1 %v810_v60  ;;  %2357 = vmatpush3.bf16.msra.mxu0 %v2356_v61  ;;  %v1034_v60 = vld [vmem:[%s3696_s3 + $0x650] sm:$0xff]  ;;  %v1035_v61 = vld [vmem:[%s3696_s3 + $0x658] sm:$0xff] }
 0x129   :  { %2389 = vmatpush3.bf16.msra.mxu1 %v2388_v35  ;;  %1464 = vmatprep.mubr.f32.mxu0 %v825_v3  ;;  %v1066_v3 = vld [vmem:[%s3696_s3 + $0x750] sm:$0xff]  ;;  %v2406_v35 = vpack.c.bf16 %v1083_v16, %v1082_v52  ;;  %v2376_v6 = vpack.c.bf16 %v1035_v61, %v1034_v60 }
 0x12a   :  { %2359 = vmatprep.subr.bf16.mxu0 %v2358_v4  ;;  %2391 = vmatprep.subr.bf16.mxu1 %v2390_v0  ;;  %v1084_v4 = vld [vmem:[%s3696_s3 + $0x7e0] sm:$0xff]  ;;  %v1085_v0 = vld [vmem:[%s3696_s3 + $0x7e8] sm:$0xff]  ;;  %v2408_v9 = vpack.c.bf16 %v1067_v15, %v1066_v3 }
 0x12b   :  { %1465 = vmatmul.mubr.f32.gmra.mrb[26].mxu0 %v824_v10  ;;  %1539 = vmatprep.mubr.f32.mxu1 %v827_v11  ;;  %v1036_v10 = vld [vmem:[%s3696_s3 + $0x660] sm:$0xff]  ;;  %v1037_v11 = vld [vmem:[%s3696_s3 + $0x668] sm:$0xff]  ;;  %v2410_v21 = vpack.c.bf16 %v1085_v0, %v1084_v4 }
 0x12c   :  { %2361 = vmatpush3.bf16.msra.mxu0 %v2360_v23  ;;  %1540 = vmatmul.mubr.f32.gmra.mrb[26].mxu1 %v826_v22  ;;  %v1069_v22 = vld [vmem:[%s3696_s3 + $0x768] sm:$0xff]  ;;  %v1054_v23 = vld [vmem:[%s3696_s3 + $0x6f0] sm:$0xff]  ;;  %v2380_v25 = vpack.c.bf16 %v1037_v11, %v1036_v10 }
 0x12d   :  { %2393 = vmatpush3.bf16.msra.mxu1 %v2392_v5  ;;  %2363 = vmatprep.subr.bf16.mxu0 %v2362_v24  ;;  %v1055_v5 = vld [vmem:[%s3696_s3 + $0x6f8] sm:$0xff]  ;;  %v1086_v24 = vld [vmem:[%s3696_s3 + $0x7f0] sm:$0xff]  ;;  %v2412_v26 = vpack.c.bf16 %v1069_v22, %v1068_v7 }
 0x12e   :  { %2395 = vmatprep.subr.bf16.mxu1 %v2394_v33  ;;  %1609 = vmatprep.mubr.f32.mxu0 %v813_v36  ;;  %v2382_v33 = vpack.c.bf16 %v1055_v5, %v1054_v23  ;;  %v2414_v29 = vpack.c.bf16 %v1087_v30, %v1086_v24  ;;  %v1070_v36 = vld [vmem:[%s3696_s3 + $0x770] sm:$0xff] }
 0x12f   :  { %1684 = vmatprep.mubr.f32.mxu1 %v815_v46  ;;  %v2416_v46 = vpack.c.bf16 %v1071_v40, %v1070_v36 }
 0x130   :  { %2365 = vmatpush3.bf16.msra.mxu0 %v2364_v49  ;;  %v814_v49 = vmax.f32 %v3224_v8, 0.0 }
 0x131   :  { %2397 = vmatpush3.bf16.msra.mxu1 %v2396_v18  ;;  %2367 = vmatprep.subr.bf16.mxu0 %v2366_v45  ;;  %v829_v18 = vmax.f32 %v3256_v51, 0.0  ;;  %v812_v45 = vmax.f32 %v3222_v34, 0.0  ;;  %v1791_v51 = vld [vmem:[%s3697_s4] ss:$0 sm:$0xff] }
 0x132   :  { %2399 = vmatprep.subr.bf16.mxu1 %v2398_v20 }
 0x134   :  { %2369 = vmatpush3.bf16.msra.mxu0 %v2368_v38 }
 0x135   :  { %2401 = vmatpush3.bf16.msra.mxu1 %v2400_v39  ;;  %2371 = vmatprep.subr.bf16.mxu0 %v2370_v41 }
 0x136   :  { %2403 = vmatprep.subr.bf16.mxu1 %v2402_v50 }
 0x138   :  { %2373 = vmatpush3.bf16.msra.mxu0 %v2372_v31 }
 0x139   :  { %2405 = vmatpush3.bf16.msra.mxu1 %v2404_v42  ;;  %2375 = vmatprep.subr.bf16.mxu0 %v2374_v59 }
 0x13a   :  { %2407 = vmatprep.subr.bf16.mxu1 %v2406_v35 }
 0x13c   :  { %2377 = vmatpush3.bf16.msra.mxu0 %v2376_v6 }
 0x13d   :  { %2409 = vmatpush3.bf16.msra.mxu1 %v2408_v9  ;;  %2379 = vmatprep.subr.bf16.mxu0 %v2378_v13 }
 0x13e   :  { %2411 = vmatprep.subr.bf16.mxu1 %v2410_v21 }
 0x140   :  { %2381 = vmatpush3.bf16.msra.mxu0 %v2380_v25 }
 0x141   :  { %2413 = vmatpush3.bf16.msra.mxu1 %v2412_v26  ;;  %2383 = vmatprep.subr.bf16.mxu0 %v2382_v33 }
 0x142   :  { %2415 = vmatprep.subr.bf16.mxu1 %v2414_v29 }
 0x144   :  { %2385 = vmatpush3.bf16.msra.mxu0 %v2384_v43 }
 0x145   :  { %2417 = vmatpush3.bf16.msra.mxu1 %v2416_v46 }
 0x147   :  { %1610 = vmatmul.mubr.f32.vlgmr.msra.gmra.mrb[28].mxu0 %v812_v45 }
 0x148   :  { %1685 = vmatmul.mubr.f32.vlgmr.msra.gmra.mrb[28].mxu1 %v814_v49  ;;  %1614 = vmatprep.mubr.f32.mxu0 %v829_v18 }
 0x149   :  { %1689 = vmatprep.mubr.f32.mxu1 %v831_v19 }
 0x14b   :  { %1615 = vmatmul.mubr.f32.gmra.mrb[30].mxu0 %v828_v1 }
 0x14c   :  { %1690 = vmatmul.mubr.f32.gmra.mrb[30].mxu1 %v830_v54 }
 0x1ba   :  { %v1826_v20 = vpop.f32.mrb[16].mxu0 }
 0x1bb   :  { %v1864_v8 = vpop.f32.mrb[16].mxu1  ;;  %v1827_v34 = vpop.f32.mrb[17].mxu0 }
 0x1bc   :  { %v1828_v47 = vadd.f32 %v1827_v34, %v1826_v20  ;;  %v1865_v53 = vpop.f32.mrb[17].mxu1  ;;  %v2430_v20 = vld [vmem:[%s3693_s0] sm:$0xff] }
 0x1bd   :  { %v1866_v44 = vadd.f32 %v1865_v53, %v1864_v8 }
 0x1be   :  { %v1162_v55 = vadd.f32 %v1828_v47, %v1791_v51  ;;  %v1829_v56 = vpop.f32.mrb[18].mxu0  ;;  %v2431_v47 = vld [vmem:[%s3693_s0 + $0x8] sm:$0xff] }
 0x1bf   :  { %v1830_v17 = vpop.f32.mrb[19].mxu0  ;;  %v1867_v58 = vpop.f32.mrb[18].mxu1 }
 0x1c0   :  { %v1237_v38 = vadd.f32 %v1866_v44, %v1162_v55  ;;  %v1831_v39 = vadd.f32 %v1830_v17, %v1829_v56  ;;  %v1868_v37 = vpop.f32.mrb[19].mxu1 }
 0x1c1   :  { %v1869_v41 = vadd.f32 %v1868_v37, %v1867_v58 }
 0x1c2   :  { %v1167_v2 = vadd.f32 %v1831_v39, %v1791_v51 }
 0x1c4   :  { %v1242_v48 = vadd.f32 %v1869_v41, %v1167_v2 }
 0x1da   :  { %v1902_v57 = vpop.f32.mrb[20].mxu0 }
 0x1db   :  { %v1940_v50 = vpop.f32.mrb[20].mxu1  ;;  %v1903_v14 = vpop.f32.mrb[21].mxu0 }
 0x1dc   :  { %v1904_v12 = vadd.f32 %v1903_v14, %v1902_v57  ;;  %v1941_v32 = vpop.f32.mrb[21].mxu1 }
 0x1dd   :  { %v1942_v52 = vadd.f32 %v1941_v32, %v1940_v50 }
 0x1de   :  { %v1312_v16 = vadd.f32 %v1904_v12, %v1237_v38  ;;  %v1905_v31 = vpop.f32.mrb[22].mxu0 }
 0x1df   :  { %v1906_v42 = vpop.f32.mrb[23].mxu0  ;;  %v1943_v59 = vpop.f32.mrb[22].mxu1 }
 0x1e0   :  { %v1387_v60 = vadd.f32 %v1942_v52, %v1312_v16  ;;  %v1907_v61 = vadd.f32 %v1906_v42, %v1905_v31  ;;  %v1944_v3 = vpop.f32.mrb[23].mxu1 }
 0x1e1   :  { %v1945_v35 = vadd.f32 %v1944_v3, %v1943_v59 }
 0x1e2   :  { %v1317_v15 = vadd.f32 %v1907_v61, %v1242_v48 }
 0x1e4   :  { %v1392_v62 = vadd.f32 %v1945_v35, %v1317_v15 }
 0x1fa   :  { %v1978_v63 = vpop.f32.mrb[24].mxu0 }
 0x1fb   :  { %v2016_v4 = vpop.f32.mrb[24].mxu1  ;;  %v1979_v0 = vpop.f32.mrb[25].mxu0 }
 0x1fc   :  { %v1980_v6 = vadd.f32 %v1979_v0, %v1978_v63  ;;  %v2017_v9 = vpop.f32.mrb[25].mxu1  ;;  %v1792_v63 = vld [vmem:[%s3698_s5] ss:$0 sm:$0xff]  ;;  %s2432_s5 = scalar_lea.vmem %s1765_s24, 256 }
 0x1fd   :  { %v2018_v13 = vadd.f32 %v2017_v9, %v2016_v4  ;;  %p2433_p0 = scmp.ne.s32.totalorder %s1765_s24, %s2432_s5  ;;  %p2438_p2 = scmp.lt.s32.totalorder %s2432_s5, %s2432_s5 }
 0x1fe   :  { %v1462_v10 = vadd.f32 %v1980_v6, %v1387_v60  ;;  %v1981_v11 = vpop.f32.mrb[26].mxu0  ;;  %v1793_v6 = vld [vmem:[%s3699_s6] ss:$0 sm:$0xff] }
 0x1ff   :  { %v1982_v7 = vpop.f32.mrb[27].mxu0  ;;  %v2019_v21 = vpop.f32.mrb[26].mxu1  ;;  %p2439_p3 = por %p2438_p2, %p2437_p1 }
 0x200   :  { %v1537_v22 = vadd.f32 %v2018_v13, %v1462_v10  ;;  %v1983_v23 = vadd.f32 %v1982_v7, %v1981_v11  ;;  %v2020_v5 = vpop.f32.mrb[27].mxu1 }
 0x201   :  { %v2021_v24 = vadd.f32 %v2020_v5, %v2019_v21  ;;  %p2440_p4 = pnand %p2439_p3, %p2433_p0 }
 0x202   :  { %v1467_v30 = vadd.f32 %v1983_v23, %v1392_v62 }
 0x204   :  { %v1542_v25 = vadd.f32 %v2021_v24, %v1467_v30 }
 0x21a   :  { %v2054_v26 = vpop.f32.mrb[28].mxu0 }
 0x21b   :  { %v2092_v33 = vpop.f32.mrb[28].mxu1  ;;  %v2055_v27 = vpop.f32.mrb[29].mxu0 }
 0x21c   :  { %v2056_v28 = vadd.f32 %v2055_v27, %v2054_v26  ;;  %v2093_v29 = vpop.f32.mrb[29].mxu1 }
 0x21d   :  { %v2094_v36 = vadd.f32 %v2093_v29, %v2092_v33 }
 0x21e   :  { %v1612_v40 = vadd.f32 %v2056_v28, %v1537_v22  ;;  %v2057_v43 = vpop.f32.mrb[30].mxu0 }
 0x21f   :  { %v2095_v46 = vpop.f32.mrb[30].mxu1  ;;  %v2058_v49 = vpop.f32.mrb[31].mxu0 }
 0x220   :  { %v1687_v18 = vadd.f32 %v2094_v36, %v1612_v40  ;;  %v2059_v45 = vadd.f32 %v2058_v49, %v2057_v43  ;;  %v2096_v19 = vpop.f32.mrb[31].mxu1 }
 0x221   :  { %v2097_v54 = vadd.f32 %v2096_v19, %v2095_v46 }
 0x222   :  { %v1617_v1 = vadd.f32 %v2059_v45, %v1542_v25  ;;  %v1695_v8 = vadd.f32 %v2430_v20, %v1687_v18 }
 0x224   :  { %v1692_v51 = vadd.f32 %v2097_v54, %v1617_v1  ;;  %v1697_v34 = vsel %vm177_vm0, %v1695_v8, 0.0 }
 0x225   :  { %1698 = vadd.xlane.f32.xlu0 %v1697_v34 }
 0x226   :  { %v1696_v53 = vadd.f32 %v2431_v47, %v1692_v51 }
 0x228   :  { %v1700_v44 = vsel %vm177_vm0, %v1696_v53, 0.0 }
 0x229   :  { %1701 = vadd.xlane.f32.xlu0 %v1700_v44 }
 0x2b2   :  { %v1699_v55 = vpop.xlane.xlu0 %1698 }
 0x2b3   :  { %v1704_v56 = vmul.f32 0.03125, %v1699_v55 }
 0x2b5   :  { %v1706_v17 = vsub.f32 %v1695_v8, %v1704_v56 }
 0x2b6   :  { %v1702_v58 = vpop.xlane.xlu0 %1701 }
 0x2b7   :  { %v1705_v38 = vmul.f32 0.03125, %v1702_v58  ;;  %v1708_v39 = vmul.f32 %v1706_v17, %v1706_v17  ;;  %v1740_v4 = vmul.f32 %v1792_v63, %v1706_v17 }
 0x2b9   :  { %v1707_v37 = vsub.f32 %v1696_v53, %v1705_v38  ;;  %v1710_v41 = vsel %vm177_vm0, %v1708_v39, 0.0 }
 0x2ba   :  { %1711 = vadd.xlane.f32.xlu1 %v1710_v41 }
 0x2bb   :  { %v1709_v2 = vmul.f32 %v1707_v37, %v1707_v37  ;;  %v1741_v13 = vmul.f32 %v1792_v63, %v1707_v37 }
 0x2bd   :  { %v1713_v48 = vsel %vm177_vm0, %v1709_v2, 0.0 }
 0x2be   :  { %1714 = vadd.xlane.f32.xlu1 %v1713_v48 }
 0x347   :  { %v1712_v57 = vpop.xlane.xlu1 %1711 }
 0x348   :  { %v1717_v50 = vmul.f32 0.032258064, %v1712_v57 }
 0x34a   :  { %2422 = vrsqrt.f32 %v1717_v50  ;;  %vm1721_vm1 = vcmp.eq.f32.partialorder %v1717_v50, inf  ;;  %v1724_v16 = vand.u32 2147483648, %v1717_v50  ;;  %vm1723_vm2 = vcmp.eq.f32.partialorder %v1717_v50, 0.0 }
 0x34b   :  { %v1715_v14 = vpop.xlane.xlu1 %1714 }
 0x34c   :  { %v1718_v12 = vmul.f32 0.032258064, %v1715_v14 }
 0x34e   :  { %2424 = vrsqrt.f32 %v1718_v12  ;;  %vm1728_vm3 = vcmp.eq.f32.partialorder %v1718_v12, inf  ;;  %v1731_v3 = vand.u32 2147483648, %v1718_v12  ;;  %vm1730_vm4 = vcmp.eq.f32.partialorder %v1718_v12, 0.0 }
 0x354   :  { %v2423_v32 = vpop.eup %2422 }
 0x355   :  { %v1720_v52 = vmul.f32 %v2423_v32, %v1717_v50 }
 0x357   :  { %v1722_v31 = vsel %vm1721_vm1, %v1717_v50, %v1720_v52 }
 0x358   :  { %v2425_v42 = vpop.eup %2424  ;;  %v1725_v59 = vsel %vm1723_vm2, %v1724_v16, %v1722_v31 }
 0x359   :  { %v1742_v60 = vadd.f32 1e-06, %v1725_v59  ;;  %v1727_v61 = vmul.f32 %v2425_v42, %v1718_v12 }
 0x35b   :  { %2426 = vrcp.f32 %v1742_v60  ;;  %v1729_v35 = vsel %vm1728_vm3, %v1718_v12, %v1727_v61 }
 0x35c   :  { %v1732_v15 = vsel %vm1730_vm4, %v1731_v3, %v1729_v35 }
 0x35d   :  { %v1743_v62 = vadd.f32 1e-06, %v1732_v15 }
 0x35f   :  { %2428 = vrcp.f32 %v1743_v62 }
 0x365   :  { %v2427_v0 = vpop.eup %2426 }
 0x366   :  { %v1745_v9 = vmul.f32 %v2427_v0, %v1740_v4 }
 0x368   :  { %v1755_v10 = vadd.f32 %v1793_v6, %v1745_v9 }
 0x369   :  { %v2429_v11 = vpop.eup %2428 }
 0x36a   :  { %v1747_v7 = vmul.f32 %v2429_v11, %v1741_v13  ;;  %1757 = vst.msk [vmem:[#allocation2] sm:$0xff] %vm177_vm0, %v1755_v10 }
 0x36c   :  { %v1756_v21 = vadd.f32 %v1793_v6, %v1747_v7 }
 0x36e   :  { %1758 = vst.msk [vmem:[#allocation2 + $0x8] sm:$0xff] %vm177_vm0, %v1756_v21 }
 0x36f   :  { %2443 = shalt.err (!%p2440_p4)
}
 0x370   :  { %s2444_s25 = scalar_lea.hbm %s3700_s7, 256 }
 0x371   :  { %p2445_p5 = scmp.ne.s32.totalorder %s3700_s7, %s2444_s25  ;;  %p2448_p6 = scmp.lt.u32.totalorder %s2444_s25, %s3700_s7 }
 0x373   :  { %p2450_p7 = pnand %p2448_p6, %p2445_p5 }
 0x375   :  { %2453 = shalt.err (!%p2450_p7)
}
 0x376   :  { %s2458_s30 = smov 128   ;;  %s2459_s8 = smov 8  }
 0x377   :  { %1770 = dma.vmem_to_hbm [thread:$0]  %s1765_s24, 256, %s3700_s7, [#allocation3], %s2458_s30, %s2458_s30, %s2459_s8  }
 0x378   :  { %2454 = dma.done.wait [#allocation3], 256  }
 0x379   :  { %2455 = vsyncadd [#allocation3], 4294967040 }
 0x37a   :  { %1774 = vsyncpa [#allocation3], 1 }

</bundles_post_ra>
